<compile_context>
chip_gen: v7x
topology: tpu7x:2x2x1
jax: 0.10.0
libtpu: 0.0.40
codegen_flags: <defaults>
</compile_context>

<pallas_src>
import functools
import math

import jax
import jax.numpy as jnp
import numpy as np
from jax.experimental import pallas as pl
from jax.experimental.pallas import tpu as pltpu

# ---- module constants (from stanet.py) -------------------------------------
cnn_kernel_num = 64
time_len = 1
sa_block_num = math.ceil(time_len)                      # = 1
sa_channel_dense_num = cnn_kernel_num * sa_block_num    # = 64
sa_kq = 50
# `sample_len` is a module-level global in the original stanet.py not shown in
# the snippet; fix it deterministically here.
sample_len = 16  # TODO(synk): original stanet.py defines sample_len elsewhere.

IN_DIM = sa_block_num * cnn_kernel_num                  # 64
KQ_PAD = 128                                            # sa_kq zero-padded to a full lane width


def _elu(x):
    return jnp.where(x > 0, x, jnp.exp(x) - 1.0)


def temporal_attention_kernel(
    x_ref,      # (BB, T, C)
    wk_ref,     # (C, KQ_PAD)   zero-padded cols 50..127
    bk_ref,     # (1, KQ_PAD)   zero-padded
    wq_ref,     # (C, KQ_PAD)
    bq_ref,     # (1, KQ_PAD)
    wv_ref,     # (C, C_out)
    bv_ref,     # (1, C_out)
    y_ref,      # (BB, T, C_out)
    *, bb, t, scale,
):
    c = x_ref.shape[-1]
    c_out = y_ref.shape[-1]

    # Flatten the batch block so the projections are single large MXU matmuls.
    x2d = x_ref[...].reshape(bb * t, c)                       # (BB*T, C)

    # Dense K / Q / V (dropout is identity at inference).
    k = _elu(jnp.dot(x2d, wk_ref[...], preferred_element_type=jnp.float32)
             + bk_ref[...])                                   # (BB*T, 128)
    q = _elu(jnp.dot(x2d, wq_ref[...], preferred_element_type=jnp.float32)
             + bq_ref[...])                                   # (BB*T, 128)
    v = jnp.tanh(jnp.dot(x2d, wv_ref[...], preferred_element_type=jnp.float32)
                 + bv_ref[...])                               # (BB*T, C_out)

    k3 = k.reshape(bb, t, KQ_PAD)
    q3 = q.reshape(bb, t, KQ_PAD)
    v3 = v.reshape(bb, t, c_out)

    # w[b,i,j] = sum_d k[b,i,d] * q[b,j,d]  (contract last axes: no transpose).
    # Padded columns of k/q are exactly 0 (ELU(0)=0), so the result is exact.
    w = jnp.einsum("bid,bjd->bij", k3, q3,
                   preferred_element_type=jnp.float32)        # (BB, T, T)
    w = w * scale

    # Softmax over dim=1 of (B, T, T)  ==  axis 1 of the per-block (BB, T, T).
    w_max = jnp.max(w, axis=1, keepdims=True)
    e = jnp.exp(w - w_max)
    denom = jnp.sum(e, axis=1, keepdims=True)
    w_sm = e * pl.reciprocal(denom, approx=False)

    # y = w_sm @ v  (batched)
    y_ref[...] = jnp.einsum("bij,bjc->bic", w_sm, v3,
                            preferred_element_type=jnp.float32)


def _choose_bb(B, T, target_rows=256):
    """Largest divisor of B with BB*T <= target_rows; keep >=2 grid steps
    (v7x has two TensorCores) whenever B allows."""
    best = 1
    for bb in range(1, B + 1):
        if B % bb == 0 and bb * T <= target_rows:
            best = bb
    if B // best < 2:
        for bb in range(best - 1, 0, -1):
            if B % bb == 0 and B // bb >= 2:
                best = bb
                break
    return best


def my_temporal_attention(x_nct, params):
    """x_nct: (B, C, T) float32 — matches the PyTorch forward's input."""
    wk, bk, wq, bq, wv, bv = params
    B, C, T = x_nct.shape
    assert C == IN_DIM
    x_btc = jnp.transpose(x_nct, (0, 2, 1))                   # permute(0, 2, 1)

    C_out = wv.shape[1]

    # Zero-pad sa_kq -> 128 lanes (weights AND biases; exact, see kernel).
    pad = KQ_PAD - wk.shape[1]
    wk_p = jnp.pad(wk, ((0, 0), (0, pad)))
    bk_p = jnp.pad(bk, ((0, 0), (0, pad)))
    wq_p = jnp.pad(wq, ((0, 0), (0, pad)))
    bq_p = jnp.pad(bq, ((0, 0), (0, pad)))

    BB = _choose_bb(B, T)
    grid = (B // BB,)

    kernel = functools.partial(
        temporal_attention_kernel,
        bb=BB, t=T, scale=1.0 / math.sqrt(sample_len))

    grid_spec = pltpu.PrefetchScalarGridSpec(
        num_scalar_prefetch=0,
        grid=grid,
        in_specs=[
            pl.BlockSpec((BB, T, C), lambda b: (b, 0, 0)),
            pl.BlockSpec((C, KQ_PAD), lambda b: (0, 0)),
            pl.BlockSpec((1, KQ_PAD), lambda b: (0, 0)),
            pl.BlockSpec((C, KQ_PAD), lambda b: (0, 0)),
            pl.BlockSpec((1, KQ_PAD), lambda b: (0, 0)),
            pl.BlockSpec((C, C_out), lambda b: (0, 0)),
            pl.BlockSpec((1, C_out), lambda b: (0, 0)),
        ],
        out_specs=pl.BlockSpec((BB, T, C_out), lambda b: (b, 0, 0)),
    )

    return pl.pallas_call(
        kernel,
        out_shape=jax.ShapeDtypeStruct((B, T, C_out), jnp.float32),
        grid_spec=grid_spec,
        compiler_params=pltpu.CompilerParams(
            dimension_semantics=("parallel",)),
    )(x_btc, wk_p, bk_p, wq_p, bq_p, wv, bv)


def reference(x_nct, params):
    wk, bk, wq, bq, wv, bv = params
    x = jnp.transpose(x_nct, (0, 2, 1))                       # (B, T, C)
    k = _elu(jnp.einsum("btc,co->bto", x, wk) + bk)
    q = _elu(jnp.einsum("btc,co->bto", x, wq) + bq)
    v = jnp.tanh(jnp.einsum("btc,co->bto", x, wv) + bv)
    w = jnp.einsum("btk,bsk->bts", k, q) / math.sqrt(sample_len)
    w = jax.nn.softmax(w, axis=1)                             # dim=1
    return jnp.einsum("bts,bsc->btc", w, v)


def init_params(key):
    """PyTorch Linear(in, out) default uniform(-1/sqrt(in), 1/sqrt(in)).
    Weights stored pre-transposed as (in, out); biases as (1, out)."""
    ks = jax.random.split(key, 6)
    bound = 1.0 / math.sqrt(IN_DIM)

    def u(k, shape):
        return jax.random.uniform(k, shape, jnp.float32, -bound, bound)

    wk = u(ks[0], (IN_DIM, sa_kq))
    bk = u(ks[1], (1, sa_kq))
    wq = u(ks[2], (IN_DIM, sa_kq))
    bq = u(ks[3], (1, sa_kq))
    wv = u(ks[4], (IN_DIM, sa_channel_dense_num))
    bv = u(ks[5], (1, sa_channel_dense_num))
    return (wk, bk, wq, bq, wv, bv)


if __name__ == "__main__":
    key = jax.random.PRNGKey(0)
    k_x, k_p = jax.random.split(key)

    B, T = 32, 8   # -> BB = 16 batches/block, grid = (2,), M = BB*T = 128
    x = jax.random.normal(k_x, (B, IN_DIM, T), dtype=jnp.float32)  # (B, C, T)
    params = init_params(k_p)

    y = jax.block_until_ready(my_temporal_attention(x, params))
    y_ref = jax.block_until_ready(reference(x, params))

    assert y.shape == (B, T, sa_channel_dense_num)
    np.testing.assert_allclose(np.asarray(y), np.asarray(y_ref),
                               rtol=1e-5, atol=1e-5)
    print("KERNEL_OK")
</pallas_src>

<mosaic_0001>
module attributes {stable_mosaic.version = 11 : i64} {
  func.func @temporal_attention_kernel(%arg0: i32, %arg1: memref<16x8x64xf32, #tpu.memory_space<vmem>>, %arg2: memref<64x128xf32, #tpu.memory_space<vmem>>, %arg3: memref<1x128xf32, #tpu.memory_space<vmem>>, %arg4: memref<64x128xf32, #tpu.memory_space<vmem>>, %arg5: memref<1x128xf32, #tpu.memory_space<vmem>>, %arg6: memref<64x64xf32, #tpu.memory_space<vmem>>, %arg7: memref<1x64xf32, #tpu.memory_space<vmem>>, %arg8: memref<16x8x64xf32, #tpu.memory_space<vmem>>) attributes {dimension_semantics = [#tpu.dimension_semantics<parallel>], iteration_bounds = array<i64: 2>, scalar_prefetch = 0 : i64, scratch_operands = 0 : i64, tpu.core_type = #tpu.core_type<tc>, window_params = [{transform_indices = @transform_0, window_bounds = array<i64: 16, 8, 64>}, {pipeline_mode = #tpu.pipeline_mode<synchronous>, transform_indices = @transform_1, window_bounds = array<i64: 64, 128>}, {pipeline_mode = #tpu.pipeline_mode<synchronous>, transform_indices = @transform_2, window_bounds = array<i64: 1, 128>}, {pipeline_mode = #tpu.pipeline_mode<synchronous>, transform_indices = @transform_3, window_bounds = array<i64: 64, 128>}, {pipeline_mode = #tpu.pipeline_mode<synchronous>, transform_indices = @transform_4, window_bounds = array<i64: 1, 128>}, {pipeline_mode = #tpu.pipeline_mode<synchronous>, transform_indices = @transform_5, window_bounds = array<i64: 64, 64>}, {pipeline_mode = #tpu.pipeline_mode<synchronous>, transform_indices = @transform_6, window_bounds = array<i64: 1, 64>}, {transform_indices = @transform_7, window_bounds = array<i64: 16, 8, 64>}]} {
    %c0 = arith.constant 0 : index
    %c0_0 = arith.constant 0 : index
    %c0_1 = arith.constant 0 : index
    %0 = vector.load %arg1[%c0, %c0_0, %c0_1] : memref<16x8x64xf32, #tpu.memory_space<vmem>>, vector<16x8x64xf32>
    %1 = vector.shape_cast %0 : vector<16x8x64xf32> to vector<128x64xf32>
    %c0_2 = arith.constant 0 : index
    %c0_3 = arith.constant 0 : index
    %2 = vector.load %arg2[%c0_2, %c0_3] : memref<64x128xf32, #tpu.memory_space<vmem>>, vector<64x128xf32>
    %cst = arith.constant dense<0.000000e+00> : vector<128x128xf32>
    %3 = tpu.matmul %1, %2, %cst {dimension_numbers = #tpu.dot_dimension_numbers<[1], [0], [0], [1], [0, 0, 1, 1], [], []>} : vector<128x64xf32>, vector<64x128xf32>, vector<128x128xf32> -> vector<128x128xf32>
    %c0_4 = arith.constant 0 : index
    %c0_5 = arith.constant 0 : index
    %4 = vector.load %arg3[%c0_4, %c0_5] : memref<1x128xf32, #tpu.memory_space<vmem>>, vector<1x128xf32>
    %5 = vector.broadcast %4 : vector<1x128xf32> to vector<128x128xf32>
    %6 = arith.addf %3, %5 : vector<128x128xf32>
    %cst_6 = arith.constant 0.000000e+00 : f32
    %7 = vector.broadcast %cst_6 : f32 to vector<128x128xf32>
    %8 = arith.cmpf ogt, %6, %7 : vector<128x128xf32>
    %9 = math.exp %6 : vector<128x128xf32>
    %cst_7 = arith.constant 1.000000e+00 : f32
    %10 = vector.broadcast %cst_7 : f32 to vector<128x128xf32>
    %11 = arith.subf %9, %10 : vector<128x128xf32>
    %12 = arith.select %8, %6, %11 : vector<128x128xi1>, vector<128x128xf32>
    %c0_8 = arith.constant 0 : index
    %c0_9 = arith.constant 0 : index
    %13 = vector.load %arg4[%c0_8, %c0_9] : memref<64x128xf32, #tpu.memory_space<vmem>>, vector<64x128xf32>
    %cst_10 = arith.constant dense<0.000000e+00> : vector<128x128xf32>
    %14 = tpu.matmul %1, %13, %cst_10 {dimension_numbers = #tpu.dot_dimension_numbers<[1], [0], [0], [1], [0, 0, 1, 1], [], []>} : vector<128x64xf32>, vector<64x128xf32>, vector<128x128xf32> -> vector<128x128xf32>
    %c0_11 = arith.constant 0 : index
    %c0_12 = arith.constant 0 : index
    %15 = vector.load %arg5[%c0_11, %c0_12] : memref<1x128xf32, #tpu.memory_space<vmem>>, vector<1x128xf32>
    %16 = vector.broadcast %15 : vector<1x128xf32> to vector<128x128xf32>
    %17 = arith.addf %14, %16 : vector<128x128xf32>
    %cst_13 = arith.constant 0.000000e+00 : f32
    %18 = vector.broadcast %cst_13 : f32 to vector<128x128xf32>
    %19 = arith.cmpf ogt, %17, %18 : vector<128x128xf32>
    %20 = math.exp %17 : vector<128x128xf32>
    %cst_14 = arith.constant 1.000000e+00 : f32
    %21 = vector.broadcast %cst_14 : f32 to vector<128x128xf32>
    %22 = arith.subf %20, %21 : vector<128x128xf32>
    %23 = arith.select %19, %17, %22 : vector<128x128xi1>, vector<128x128xf32>
    %c0_15 = arith.constant 0 : index
    %c0_16 = arith.constant 0 : index
    %24 = vector.load %arg6[%c0_15, %c0_16] : memref<64x64xf32, #tpu.memory_space<vmem>>, vector<64x64xf32>
    %cst_17 = arith.constant dense<0.000000e+00> : vector<128x64xf32>
    %25 = tpu.matmul %1, %24, %cst_17 {dimension_numbers = #tpu.dot_dimension_numbers<[1], [0], [0], [1], [0, 0, 1, 1], [], []>} : vector<128x64xf32>, vector<64x64xf32>, vector<128x64xf32> -> vector<128x64xf32>
    %c0_18 = arith.constant 0 : index
    %c0_19 = arith.constant 0 : index
    %26 = vector.load %arg7[%c0_18, %c0_19] : memref<1x64xf32, #tpu.memory_space<vmem>>, vector<1x64xf32>
    %27 = vector.broadcast %26 : vector<1x64xf32> to vector<128x64xf32>
    %28 = arith.addf %25, %27 : vector<128x64xf32>
    %29 = math.tanh %28 : vector<128x64xf32>
    %30 = vector.shape_cast %12 : vector<128x128xf32> to vector<16x8x128xf32>
    %31 = vector.shape_cast %23 : vector<128x128xf32> to vector<16x8x128xf32>
    %32 = vector.shape_cast %29 : vector<128x64xf32> to vector<16x8x64xf32>
    "tpu.trace_start"() <{level = 10 : i32, message = "bid,bjd->bij"}> : () -> ()
    %cst_20 = arith.constant dense<0.000000e+00> : vector<16x8x8xf32>
    %33 = tpu.matmul %30, %31, %cst_20 {dimension_numbers = #tpu.dot_dimension_numbers<[2], [2], [1], [1], [0, 0, 0, 1, 1, 1], [0], [0]>} : vector<16x8x128xf32>, vector<16x8x128xf32>, vector<16x8x8xf32> -> vector<16x8x8xf32>
    "tpu.trace_stop"() : () -> ()
    %cst_21 = arith.constant 2.500000e-01 : f32
    %34 = vector.broadcast %cst_21 : f32 to vector<16x8x8xf32>
    %35 = arith.mulf %33, %34 : vector<16x8x8xf32>
    %cst_22 = arith.constant dense<0xFF800000> : vector<16x8xf32>
    %36 = vector.multi_reduction <maximumf>, %35, %cst_22 [1] : vector<16x8x8xf32> to vector<16x8xf32>
    %37 = vector.shape_cast %36 : vector<16x8xf32> to vector<16x1x8xf32>
    %38 = vector.broadcast %37 : vector<16x1x8xf32> to vector<16x8x8xf32>
    %39 = arith.subf %35, %38 : vector<16x8x8xf32>
    %40 = math.exp %39 : vector<16x8x8xf32>
    %cst_23 = arith.constant dense<0.000000e+00> : vector<16x8xf32>
    %41 = vector.multi_reduction <add>, %40, %cst_23 [1] : vector<16x8x8xf32> to vector<16x8xf32>
    %42 = vector.shape_cast %41 : vector<16x8xf32> to vector<16x1x8xf32>
    %43 = tpu.reciprocal %42 : vector<16x1x8xf32> -> vector<16x1x8xf32>
    %44 = vector.broadcast %43 : vector<16x1x8xf32> to vector<16x8x8xf32>
    %45 = arith.mulf %40, %44 : vector<16x8x8xf32>
    "tpu.trace_start"() <{level = 10 : i32, message = "bij,bjc->bic"}> : () -> ()
    %cst_24 = arith.constant dense<0.000000e+00> : vector<16x8x64xf32>
    %46 = tpu.matmul %45, %32, %cst_24 {dimension_numbers = #tpu.dot_dimension_numbers<[2], [1], [1], [2], [0, 0, 0, 1, 1, 2], [0], [0]>} : vector<16x8x8xf32>, vector<16x8x64xf32>, vector<16x8x64xf32> -> vector<16x8x64xf32>
    "tpu.trace_stop"() : () -> ()
    %c0_25 = arith.constant 0 : index
    %c0_26 = arith.constant 0 : index
    %c0_27 = arith.constant 0 : index
    %47 = vector.load %arg8[%c0_25, %c0_26, %c0_27] : memref<16x8x64xf32, #tpu.memory_space<vmem>>, vector<16x8x64xf32>
    tpu.vector_store %arg8[%c0_25, %c0_26, %c0_27], %46 {strides = array<i32>} : memref<16x8x64xf32, #tpu.memory_space<vmem>>, vector<16x8x64xf32>,
    return
  }
  func.func @transform_0(%arg0: i32) -> (i32, i32, i32) {
    %c0_i32 = arith.constant 0 : i32
    %c0_i32_0 = arith.constant 0 : i32
    %c0_i32_1 = arith.constant 0 : i32
    return %arg0, %c0_i32, %c0_i32_0 : i32, i32, i32
  }
  func.func @transform_1(%arg0: i32) -> (i32, i32) {
    %c0_i32 = arith.constant 0 : i32
    %c0_i32_0 = arith.constant 0 : i32
    %c0_i32_1 = arith.constant 0 : i32
    return %c0_i32, %c0_i32_0 : i32, i32
  }
  func.func @transform_2(%arg0: i32) -> (i32, i32) {
    %c0_i32 = arith.constant 0 : i32
    %c0_i32_0 = arith.constant 0 : i32
    %c0_i32_1 = arith.constant 0 : i32
    return %c0_i32, %c0_i32_0 : i32, i32
  }
  func.func @transform_3(%arg0: i32) -> (i32, i32) {
    %c0_i32 = arith.constant 0 : i32
    %c0_i32_0 = arith.constant 0 : i32
    %c0_i32_1 = arith.constant 0 : i32
    return %c0_i32, %c0_i32_0 : i32, i32
  }
  func.func @transform_4(%arg0: i32) -> (i32, i32) {
    %c0_i32 = arith.constant 0 : i32
    %c0_i32_0 = arith.constant 0 : i32
    %c0_i32_1 = arith.constant 0 : i32
    return %c0_i32, %c0_i32_0 : i32, i32
  }
  func.func @transform_5(%arg0: i32) -> (i32, i32) {
    %c0_i32 = arith.constant 0 : i32
    %c0_i32_0 = arith.constant 0 : i32
    %c0_i32_1 = arith.constant 0 : i32
    return %c0_i32, %c0_i32_0 : i32, i32
  }
  func.func @transform_6(%arg0: i32) -> (i32, i32) {
    %c0_i32 = arith.constant 0 : i32
    %c0_i32_0 = arith.constant 0 : i32
    %c0_i32_1 = arith.constant 0 : i32
    return %c0_i32, %c0_i32_0 : i32, i32
  }
  func.func @transform_7(%arg0: i32) -> (i32, i32, i32) {
    %c0_i32 = arith.constant 0 : i32
    %c0_i32_0 = arith.constant 0 : i32
    %c0_i32_1 = arith.constant 0 : i32
    return %arg0, %c0_i32, %c0_i32_0 : i32, i32, i32
  }
}

</mosaic_0001>

<bundles_post_ra>
// kernel: tpu_custom_call.1
= control target key start
LH: loop header
LB: loop body
LE: loop exit
PB: predicated region body
PF: predicated region fallthrough
CT: control target
= control target key end

     0   :  { %12 = vsyncpa [#allocation3], 0  ;;  %s5852_s0 = inlined_call_operand.hbm [shape: f32[32,8,64], index: 0, kind: input, shape index: {}]   ;;  %s5853_s1 = inlined_call_operand.hbm [shape: f32[64,128], index: 1, kind: input, shape index: {}]   ;;  %s5854_s2 = inlined_call_operand.vmem [shape: f32[1,128], index: 2, kind: input, shape index: {}]   ;;  %s5855_s3 = inlined_call_operand.hbm [shape: f32[64,128], index: 3, kind: input, shape index: {}]   ;;  %s5856_s4 = inlined_call_operand.vmem [shape: f32[1,128], index: 4, kind: input, shape index: {}]   ;;  %s5857_s5 = inlined_call_operand.hbm [shape: f32[64,64], index: 5, kind: input, shape index: {}]   ;;  %s5858_s6 = inlined_call_operand.vmem [shape: f32[1,64], index: 6, kind: input, shape index: {}]   ;;  %s5859_s7 = inlined_call_operand.hbm [shape: f32[32,8,64], index: 7, kind: output, shape index: {}]  }
   0x1   :  { %14 = vsyncpa [#allocation3 + $0x1], 0 }
   0x2   :  { %15 = vsyncpa [#allocation6], 0 }
   0x3   :  { %16 = vsyncpa [#allocation9], 0 }
   0x4   :  { %17 = vsyncpa [#allocation4], 0 }
   0x5   :  { %19 = vsyncpa [#allocation4 + $0x1], 0  ;;  %s4874_s24 = smov 0   ;;  %s4876_s25 = smov 0  }
   0x6   :  { %s4878_s26 = smov 0   ;;  %s4880_s27 = smov 0  }
   0x7 LB: > { %s4895_s28 = sadd.s32 4294967295, %s4821_s27   ;;  %s3805_s29 = sadd.s32 4294967294, %s4821_s27   ;;  %s4821_s27 = sphi %s4880_s27, %s5885_s27   ;;  %s4817_s26 = sphi %s4878_s26, %s5884_s26   ;;  %s4813_s25 = sphi %s4876_s25, %s5883_s25   ;;  %s4809_s24 = sphi %s4874_s24, %s5882_s24  }
   0x8   : > { %p45_p0 = scmp.ne.s32.totalorder %s4813_s25, %s4809_s24  ;;  %p5860_p1 = scmp.eq.s32.totalorder %s4895_s28, 0 }
   0x9   : > { %p201_p3 = scmp.eq.s32.totalorder %s3805_s29, 1  ;;  %p3806_p5 = scmp.ge.s32.totalorder %s4821_s27, 1 }
   0xa   : > { %p4904_p4 = por %p5860_p1, %p45_p0  ;;  %p208_p7 = scmp.lt.s32.totalorder %s4821_s27, 3 }
   0xb   : > { %p4909_p6 = por %p201_p3, %p45_p0  ;;  %s4823_s10 = smov [#allocation5]  }
   0xc   : > { %s5864_s30 = scalar_select %p4904_p4, 1, 0 }
   0xd   : > { %s5865_s8 = scalar_select %p4909_p6, 1, 0 }
   0xe   : > { %p4914_p8 = pnand %p3806_p5, %p208_p7  ;;  %s220_s11 = sshll.u32 %s4823_s10, 4  ;;  %s4918_s11 = int_to_ptr.vmem [resolvable:$true] %s220_s11 }
   0xf   : > { %5866 = sst [smem:[#allocation15_spill]] %s5865_s8  ;;  %s4824_s13 = smov [#allocation7]  }
  0x10   : > { %s5867_s9 = scalar_select %p4914_p8, 1, 0 }
  0x11   : > { %p4406_p9 = pneg %p4914_p8  ;;  %s236_s14 = sshll.u32 %s4824_s13, 4  ;;  %s4929_s14 = int_to_ptr.vmem [resolvable:$true] %s236_s14 }
  0x12   : > { %s4825_s15 = smov [#allocation8]   ;;  %s4633_s19 = scalar_lea.hbm %s5853_s1, 1024 }
  0x13   : > { %p4925_p11 = pnand %p4406_p9, %p5860_p1  ;;  %s4931_s16 = sshll.u32 %s4825_s15, 4  ;;  %s253_s16 = int_to_ptr.vmem [resolvable:$true] %s4931_s16 }
  0x14   : > { %p4634_p12 = scmp.ne.s32.totalorder %s5853_s1, %s4633_s19  ;;  %p4640_p5 = scmp.lt.u32.totalorder %s4633_s19, %s5853_s1 }
  0x15   : > { %p4941_p13 = pneg %p4925_p11 }
  0x17   : > { %p4636_p0 = pnand %p4941_p13, %p4634_p12 }
  0x19   : > { %p4637_p3 = pneg %p4636_p0 }
  0x1b   : > { %p4642_p7 = pnand %p4640_p5, %p4637_p3 }
  0x1d   : > { %4645 = shalt.err (!%p4642_p7)
}
  0x1e   : > { %s4646_s10 = scalar_lea.vmem %s4918_s11, 1024  ;;  %p4654_p2 = scmp.lt.s32.totalorder %s4918_s11, %s4918_s11 }
  0x1f   : > { %p4647_p9 = scmp.ne.s32.totalorder %s4918_s11, %s4646_s10  ;;  %p4655_p6 = scmp.lt.s32.totalorder %s4646_s10, %s4646_s10 }
  0x21   : > { %p4649_p10 = pnand %p4647_p9, %p4941_p13  ;;  %p4656_p12 = por %p4655_p6, %p4654_p2 }
  0x23   : > { %p4650_p1 = pneg %p4649_p10 }
  0x25   : > { %p4657_p0 = pnand %p4656_p12, %p4650_p1 }
  0x27   : > { %4660 = shalt.err (!%p4657_p0)
}
  0x28   : > { %s4826_s13 = smov 128   ;;  %s4827_s15 = smov 8  }
  0x29   : > { %4409 = dma.hbm_to_vmem [thread:$0]  (!%p4925_p11), %s5853_s1, 1024, %s4918_s11, [#allocation6], %s4826_s13, %s4826_s13, %s4827_s15  }
  0x2a   : > { %s4661_s21 = scalar_lea.hbm %s5855_s3, 1024 }
  0x2b   : > { %p4662_p1 = scmp.ne.s32.totalorder %s5855_s3, %s4661_s21  ;;  %p4668_p10 = scmp.lt.u32.totalorder %s4661_s21, %s5855_s3 }
  0x2d   : > { %p4664_p2 = pnand %p4662_p1, %p4941_p13 }
  0x2f   : > { %p4665_p6 = pneg %p4664_p2 }
  0x31   : > { %p4670_p3 = pnand %p4668_p10, %p4665_p6 }
  0x33   : > { %4673 = shalt.err (!%p4670_p3)
}
  0x34   : > { %s4674_s11 = scalar_lea.vmem %s4929_s14, 1024  ;;  %p4682_p12 = scmp.lt.s32.totalorder %s4929_s14, %s4929_s14 }
  0x35   : > { %p4675_p5 = scmp.ne.s32.totalorder %s4929_s14, %s4674_s11  ;;  %p4683_p0 = scmp.lt.s32.totalorder %s4674_s11, %s4674_s11 }
  0x37   : > { %p4677_p7 = pnand %p4675_p5, %p4941_p13  ;;  %p4684_p1 = por %p4683_p0, %p4682_p12 }
  0x39   : > { %p4678_p9 = pneg %p4677_p7 }
  0x3b   : > { %p4685_p2 = pnand %p4684_p1, %p4678_p9 }
  0x3d   : > { %4688 = shalt.err (!%p4685_p2)
}
  0x3e   : > { %4412 = dma.hbm_to_vmem [thread:$0]  (!%p4925_p11), %s5855_s3, 1024, %s4929_s14, [#allocation6], %s4826_s13, %s4826_s13, %s4827_s15  }
  0x3f   : > { %s4689_s20 = scalar_lea.hbm %s5857_s5, 1024 }
  0x40   : > { %p4690_p6 = scmp.ne.s32.totalorder %s5857_s5, %s4689_s20  ;;  %p4696_p5 = scmp.lt.u32.totalorder %s4689_s20, %s5857_s5 }
  0x42   : > { %p4692_p10 = pnand %p4690_p6, %p4941_p13 }
  0x44   : > { %p4693_p3 = pneg %p4692_p10 }
  0x46   : > { %p4698_p7 = pnand %p4696_p5, %p4693_p3 }
  0x48   : > { %4701 = shalt.err (!%p4698_p7)
}
  0x49   : > { %s4702_s11 = scalar_lea.vmem %s253_s16, 1024  ;;  %p4710_p1 = scmp.lt.s32.totalorder %s253_s16, %s253_s16 }
  0x4a   : > { %p4703_p9 = scmp.ne.s32.totalorder %s253_s16, %s4702_s11  ;;  %p4711_p2 = scmp.lt.s32.totalorder %s4702_s11, %s4702_s11 }
  0x4c   : > { %p4705_p12 = pnand %p4703_p9, %p4941_p13  ;;  %p4712_p4 = por %p4711_p2, %p4710_p1 }
  0x4e   : > { %p4706_p0 = pneg %p4705_p12 }
  0x50   : > { %p4713_p8 = pnand %p4712_p4, %p4706_p0 }
  0x52   : > { %4716 = shalt.err (!%p4713_p8)
}
  0x53   : > { %4415 = dma.hbm_to_vmem [thread:$0]  (!%p4925_p11), %s5857_s5, 1024, %s253_s16, [#allocation9], %s4826_s13, %s4826_s13, %s4827_s15  }
  0x54   : > { %s5014_s22 = sadd.s32 1, %s4821_s27   ;;  %s32_s17 = sadd.s32 1, %s4817_s26 }
  0x55   : > { %s29_s12 = ssub.s32 %s4821_s27, %s5014_s22  ;;  %p39_p8 = scmp.ne.s32.totalorder %s4817_s26, %s4813_s25 }
  0x56   : > { %p30_p4 = scmp.eq.s32.totalorder %s29_s12, 0  ;;  %p40_p13 = scmp.eq.s32.totalorder %s4821_s27, 0 }
  0x57   : > { %p4427_p6 = scmp.lt.s32.totalorder %s4821_s27, 2  ;;  %p5870_p3 = scmp.eq.s32.totalorder %s4895_s28, 1 }
  0x58   : > { %s5024_s18 = scalar_select %p30_p4, %s4817_s26, %s32_s17  }
  0x59   : > { %p41_p10 = por %p40_p13, %p39_p8  ;;  %p5028_p5 = por %p5870_p3, %p39_p8 }
  0x5a   : > { %s269_s20 = sand.u32 1, %s4817_s26   ;;  %s3924_s21 = sshll.u32 %s4821_s27, 11 }
  0x5b   : > { %s3811_s16 = sshll.u32 %s269_s20, 7  ;;  %s5037_s10 = scalar_lea.hbm %s5852_s0, %s3924_s21 }
  0x5c   : > { %s273_s11 = scalar_lea.vmem [#allocation2], %s3811_s16  ;;  %p5039_p11 = pnand %p4427_p6, %p41_p10 }
  0x5d   : > { %s280_s14 = sshll.u32 %s273_s11, 4  ;;  %s5045_s12 = scalar_lea.sflag [#allocation3], %s269_s20  ;;  %s5043_s14 = int_to_ptr.vmem [resolvable:$true] %s280_s14 }
  0x5e   : > { %s4717_s17 = scalar_lea.hbm %s5037_s10, 2048  ;;  %p4719_p9 = pneg %p5039_p11 }
  0x5f   : > { %p4718_p7 = scmp.ne.s32.totalorder %s5037_s10, %s4717_s17  ;;  %s4722_s23 = scalar_lea.hbm %s5852_s0, 4096 }
  0x60   : > { %p4723_p1 = scmp.lt.u32.totalorder %s5037_s10, %s5852_s0  ;;  %p4724_p2 = scmp.lt.u32.totalorder %s4722_s23, %s4717_s17 }
  0x61   : > { %p4720_p12 = pnand %p4719_p9, %p4718_p7  ;;  %p4726_p8 = scmp.lt.u32.totalorder %s4717_s17, %s5037_s10 }
  0x62   : > { %p4725_p4 = por %p4724_p2, %p4723_p1 }
  0x63   : > { %p4721_p0 = pneg %p4720_p12 }
  0x64   : > { %p4727_p13 = por %p4726_p8, %p4725_p4 }
  0x66   : > { %p4728_p6 = pnand %p4727_p13, %p4721_p0 }
  0x68   : > { %4731 = shalt.err (!%p4728_p6)
}
  0x69   : > { %s4732_s20 = scalar_lea.vmem %s5043_s14, 2048  ;;  %s4828_s21 = smov [#allocation2]  }
  0x6a   : > { %p4733_p10 = scmp.ne.s32.totalorder %s5043_s14, %s4732_s20  ;;  %s4737_s16 = sshll.u32 %s4828_s21, 4  ;;  %s4738_s16 = int_to_ptr.vmem [resolvable:$false] %s4737_s16 }
  0x6b   : > { %s4739_s29 = scalar_lea.vmem %s4738_s16, 4096  ;;  %p4740_p12 = scmp.lt.s32.totalorder %s5043_s14, %s4738_s16 }
  0x6c   : > { %p4735_p3 = pnand %p4733_p10, %p4719_p9  ;;  %p4741_p1 = scmp.lt.s32.totalorder %s4739_s29, %s4732_s20 }
  0x6e   : > { %p4736_p7 = pneg %p4735_p3  ;;  %p4742_p2 = por %p4741_p1, %p4740_p12 }
  0x70   : > { %p4743_p4 = pnand %p4742_p2, %p4736_p7 }
  0x72   : > { %4746 = shalt.err (!%p4743_p4)
}
  0x73   : > { %4419 = dma.hbm_to_vmem [thread:$0]  (!%p5039_p11), %s5037_s10, 2048, %s5043_s14, %s5045_s12, %s4826_s13, %s4826_s13, %s4827_s15  }
  0x74   : > { %p5873_p9 = scmp.ne.s32.totalorder %s5867_s9, 0 }
  0x75   : > { %s5079_s17 = sand.u32 (!%p5873_p9), 1, %s4813_s25   ;;  %p5874_p0 = scmp.ne.s32.totalorder (!%p5873_p9), %s5864_s30, 0 }
  0x76   : > { %292 = sbr.rel (%p5873_p9) target bundleno = 953 (0x3b9), region = 48  ;;  %s3815_s23 = sshll.u32 (!%p5873_p9), %s5079_s17, 7 }
  0x77   : > { %s295_s11 = scalar_lea.sflag (!%p5873_p9), [#allocation3], %s5079_s17  ;;  %s5085_s8 = scalar_lea.vmem (!%p5873_p9), [#allocation2], %s3815_s23 }
  0x7d   : > { %4792 = dma.done.wait (%p5874_p0), %s295_s11, 2048  }
  0x7e   : > { %4794 = vsyncadd (%p5874_p0), %s295_s11, 4294965248  ;;  %p5875_p11 = scmp.eq.s32.totalorder %s4895_s28, 0 }
  0x80   : > { %4796 = dma.done.wait (%p5875_p11), [#allocation6], 2048   ;;  %p5876_p8 = pmov %p5875_p11 }
  0x82   : > { %4798 = vsyncadd (%p5876_p8), [#allocation6], 4294965248  ;;  %p5877_p13 = pmov %p5876_p8 }
  0x83   : > { %p5878_p6 = pmov %p5876_p8 }
  0x84   : > { %4800 = dma.done.wait (%p5877_p13), [#allocation9], 1024  }
  0x85   : > { %4802 = vsyncadd (%p5878_p6), [#allocation9], 4294966272  ;;  %v648_v0 = vld [vmem:[#allocation7] sm:$0xff]  ;;  %v649_v1 = vld [vmem:[#allocation7 + $0x8] sm:$0xff]  ;;  %vm374_vm0 = vcmask 523264   ;;  %v4829_v52 = vmov 0.0  }
  0x86   : > { %v359_v2 = vld [vmem:[#allocation5] sm:$0xff]  ;;  %v4358_v3 = vpack.c.bf16 %v649_v1, %v648_v0  ;;  %v360_v4 = vld [vmem:[#allocation5 + $0x8] sm:$0xff]  ;;  %v650_v5 = vld [vmem:[#allocation7 + $0x10] sm:$0xff]  ;;  %vm4830_vm1 = vmmov 0   ;;  %s5767_s12 = scalar_lea.vmem [#allocation10], %s3815_s23  ;;  %s3925_s20 = sshll.u32 %s4895_s28, 11 }
  0x87   : > { %v651_v6 = vld [vmem:[#allocation7 + $0x18] sm:$0xff]  ;;  %v4342_v7 = vpack.c.bf16 %v360_v4, %v359_v2  ;;  %v361_v9 = vld [vmem:[#allocation5 + $0x10] sm:$0xff]  ;;  %v652_v11 = vld [vmem:[#allocation7 + $0x20] sm:$0xff]  ;;  %s3703_s21 = sshll.u32 %s5767_s12, 4  ;;  %s5804_s23 = scalar_lea.hbm %s5859_s7, %s3925_s20  ;;  %s5806_s21 = int_to_ptr.vmem [resolvable:$true] %s3703_s21 }
  0x88   : > { %v4362_v8 = vpack.c.bf16 %v651_v6, %v650_v5  ;;  %v362_v10 = vld [vmem:[#allocation5 + $0x18] sm:$0xff]  ;;  %4359 = vmatprep.subr.bf16.mxu1 %v4358_v3  ;;  %v653_v13 = vld [vmem:[#allocation7 + $0x28] sm:$0xff]  ;;  %v363_v14 = vld [vmem:[#allocation5 + $0x20] sm:$0xff]  ;;  %s3690_s28 = scalar_lea.sflag [#allocation4], %s5079_s17  ;;  %s4747_s11 = scalar_lea.vmem %s5806_s21, 2048 }
  0x89   : > { %v4346_v12 = vpack.c.bf16 %v362_v10, %v361_v9  ;;  %v364_v15 = vld [vmem:[#allocation5 + $0x28] sm:$0xff]  ;;  %4361 = vmatpush3.bf16.msra.mxu1 %v4358_v3  ;;  %4343 = vmatprep.subr.bf16.mxu0 %v4342_v7  ;;  %v4366_v16 = vpack.c.bf16 %v653_v13, %v652_v11  ;;  %v5100_v17 = vld [vmem:[%s5085_s8] sm:$0xff]  ;;  %v654_v19 = vld [vmem:[#allocation7 + $0x30] sm:$0xff]  ;;  %p4748_p10 = scmp.ne.s32.totalorder %s5806_s21, %s4747_s11 }
  0x8a   : > { %4345 = vmatpush3.bf16.msra.mxu0 %v4342_v7  ;;  %4363 = vmatprep.subr.bf16.mxu1 %v4362_v8  ;;  %v4350_v18 = vpack.c.bf16 %v364_v15, %v363_v14  ;;  %v655_v20 = vld [vmem:[#allocation7 + $0x38] sm:$0xff]  ;;  %v365_v21 = vld [vmem:[#allocation5 + $0x30] sm:$0xff]  ;;  %v888_v25 = vld [vmem:[#allocation8] sm:$0xff] }
  0x8b   : > { %4347 = vmatprep.subr.bf16.mxu0 %v4346_v12  ;;  %4118 = vmatprep.mubr.msk.f32.mxu1 %vm374_vm0, %v5100_v17  ;;  %v366_v22 = vld [vmem:[#allocation5 + $0x38] sm:$0xff]  ;;  %v4370_v23 = vpack.c.bf16 %v655_v20, %v654_v19  ;;  %v889_v26 = vld [vmem:[#allocation8 + $0x8] sm:$0xff]  ;;  %v890_v28 = vld [vmem:[#allocation8 + $0x10] sm:$0xff]  ;;  %p4749_p3 = pnand %p4748_p10, %p5028_p5 }
  0x8c   : > { %4078 = vmatprep.mubr.msk.f32.mxu0 %vm374_vm0, %v5100_v17  ;;  %v4354_v24 = vpack.c.bf16 %v366_v22, %v365_v21  ;;  %v4374_v27 = vpack.c.bf16 %v889_v26, %v888_v25  ;;  %v891_v29 = vld [vmem:[#allocation8 + $0x18] sm:$0xff]  ;;  %v344_v30 = vld [vmem:[%s5085_s8 + $0x8] sm:$0xff]  ;;  %v345_v31 = vld [vmem:[%s5085_s8 + $0x10] sm:$0xff] }
  0x8d   : > { %4365 = vmatpush3.bf16.msra.mxu1 %v4362_v8  ;;  %v4378_v32 = vpack.c.bf16 %v891_v29, %v890_v28  ;;  %v892_v33 = vld [vmem:[#allocation8 + $0x20] sm:$0xff]  ;;  %v893_v34 = vld [vmem:[#allocation8 + $0x28] sm:$0xff]  ;;  %v346_v35 = vld [vmem:[%s5085_s8 + $0x18] sm:$0xff]  ;;  %p4750_p7 = pneg %p4749_p3 }
  0x8e   : > { %4349 = vmatpush3.bf16.msra.mxu0 %v4346_v12  ;;  %4367 = vmatprep.subr.bf16.mxu1 %v4366_v16  ;;  %v347_v36 = vld [vmem:[%s5085_s8 + $0x20] sm:$0xff]  ;;  %v4382_v37 = vpack.c.bf16 %v893_v34, %v892_v33  ;;  %v348_v38 = vld [vmem:[%s5085_s8 + $0x28] sm:$0xff]  ;;  %v349_v39 = vld [vmem:[%s5085_s8 + $0x30] sm:$0xff] }
  0x8f   : > { %4351 = vmatprep.subr.bf16.mxu0 %v4350_v18  ;;  %v350_v40 = vld [vmem:[%s5085_s8 + $0x38] sm:$0xff]  ;;  %v351_v41 = vld [vmem:[%s5085_s8 + $0x40] sm:$0xff]  ;;  %v352_v42 = vld [vmem:[%s5085_s8 + $0x48] sm:$0xff] }
  0x90   : > { %v353_v43 = vld [vmem:[%s5085_s8 + $0x50] sm:$0xff]  ;;  %v354_v44 = vld [vmem:[%s5085_s8 + $0x58] sm:$0xff]  ;;  %v355_v45 = vld [vmem:[%s5085_s8 + $0x60] sm:$0xff] }
  0x91   : > { %4369 = vmatpush3.bf16.msra.mxu1 %v4366_v16  ;;  %v356_v46 = vld [vmem:[%s5085_s8 + $0x68] sm:$0xff]  ;;  %v357_v47 = vld [vmem:[%s5085_s8 + $0x70] sm:$0xff]  ;;  %v358_v48 = vld [vmem:[%s5085_s8 + $0x78] sm:$0xff]  ;;  %s4831_s8 = smov [#allocation10]  }
  0x92   : > { %4353 = vmatpush3.bf16.msra.mxu0 %v4350_v18  ;;  %4371 = vmatprep.subr.bf16.mxu1 %v4370_v23  ;;  %v894_v49 = vld [vmem:[#allocation8 + $0x30] sm:$0xff]  ;;  %v895_v50 = vld [vmem:[#allocation8 + $0x38] sm:$0xff]  ;;  %v5177_v53 = vld [vmem:[%s5856_s4] ss:$0 sm:$0xff]  ;;  %s4751_s30 = sshll.u32 %s4831_s8, 4  ;;  %s4752_s30 = int_to_ptr.vmem [resolvable:$false] %s4751_s30 }
  0x93   : > { %4355 = vmatprep.subr.bf16.mxu0 %v4354_v24  ;;  %v4386_v51 = vpack.c.bf16 %v895_v50, %v894_v49  ;;  %v5182_v55 = vld [vmem:[%s5854_s2] ss:$0 sm:$0xff]  ;;  %s4753_s9 = scalar_lea.vmem %s4752_s30, 4096  ;;  %p4754_p12 = scmp.lt.s32.totalorder %s5806_s21, %s4752_s30 }
  0x94   : > { %p4755_p1 = scmp.lt.s32.totalorder %s4753_s9, %s4747_s11 }
  0x95   : > { %4373 = vmatpush3.bf16.msra.mxu1 %v4370_v23 }
  0x96   : > { %4357 = vmatpush3.bf16.msra.mxu0 %v4354_v24  ;;  %4182 = vmatprep.subr.mxu1 %v4829_v52  ;;  %p4756_p2 = por %p4755_p1, %p4754_p12 }
  0x97   : > { %4375 = vmatprep.subr.bf16.mxu0 %v4374_v27 }
  0x98   : > { %4119 = vmatmul.mubr.msk.f32.vlgmr.msra.gmra.mrb[0].mxu1 %vm374_vm0, %v344_v30  ;;  %p4757_p4 = pnand %p4756_p2, %p4750_p7 }
  0x99   : > { %4079 = vmatmul.mubr.msk.f32.vlgmr.msra.gmra.mrb[0].mxu0 %vm374_vm0, %v344_v30  ;;  %4121 = vmatprep.mubr.msk.f32.mxu1 %vm374_vm0, %v345_v31 }
  0x9a   : > { %4081 = vmatprep.mubr.msk.f32.mxu0 %vm374_vm0, %v345_v31  ;;  %4377 = vmatpush3.bf16.msra.mxu0 %v4374_v27 }
  0x9b   : > { %4379 = vmatprep.subr.bf16.mxu0 %v4378_v32 }
  0x9c   : > { %4122 = vmatmul.mubr.msk.f32.gmra.mrb[2].mxu1 %vm374_vm0, %v346_v35 }
  0x9d   : > { %4082 = vmatmul.mubr.msk.f32.gmra.mrb[2].mxu0 %vm374_vm0, %v346_v35  ;;  %4124 = vmatprep.mubr.msk.f32.mxu1 %vm374_vm0, %v347_v36 }
  0x9e   : > { %4084 = vmatprep.mubr.msk.f32.mxu0 %vm374_vm0, %v347_v36  ;;  %4381 = vmatpush3.bf16.msra.mxu0 %v4378_v32 }
  0x9f   : > { %4383 = vmatprep.subr.bf16.mxu0 %v4382_v37 }
  0xa0   : > { %4125 = vmatmul.mubr.msk.f32.gmra.mrb[4].mxu1 %vm374_vm0, %v348_v38 }
  0xa1   : > { %4085 = vmatmul.mubr.msk.f32.gmra.mrb[4].mxu0 %vm374_vm0, %v348_v38  ;;  %4127 = vmatprep.mubr.msk.f32.mxu1 %vm374_vm0, %v349_v39 }
  0xa2   : > { %4087 = vmatprep.mubr.msk.f32.mxu0 %vm374_vm0, %v349_v39  ;;  %4385 = vmatpush3.bf16.msra.mxu0 %v4382_v37 }
  0xa3   : > { %4387 = vmatprep.subr.bf16.mxu0 %v4386_v51 }
  0xa4   : > { %4128 = vmatmul.mubr.msk.f32.gmra.mrb[6].mxu1 %vm374_vm0, %v350_v40 }
  0xa5   : > { %4088 = vmatmul.mubr.msk.f32.gmra.mrb[6].mxu0 %vm374_vm0, %v350_v40  ;;  %4130 = vmatprep.mubr.msk.f32.mxu1 %vm374_vm0, %v351_v41 }
  0xa6   : > { %4090 = vmatprep.mubr.msk.f32.mxu0 %vm374_vm0, %v351_v41  ;;  %4389 = vmatpush3.bf16.msra.mxu0 %v4386_v51 }
  0xa7   : > { %4222 = vmatprep.subr.mxu0 %v4829_v52 }
  0xa8   : > { %4131 = vmatmul.mubr.msk.f32.gmra.mrb[8].mxu1 %vm374_vm0, %v352_v42 }
  0xa9   : > { %4091 = vmatmul.mubr.msk.f32.gmra.mrb[8].mxu0 %vm374_vm0, %v352_v42  ;;  %4133 = vmatprep.mubr.msk.f32.mxu1 %vm374_vm0, %v353_v43 }
  0xaa   : > { %4093 = vmatprep.mubr.msk.f32.mxu0 %vm374_vm0, %v353_v43 }
  0xac   : > { %4134 = vmatmul.mubr.msk.f32.gmra.mrb[10].mxu1 %vm374_vm0, %v354_v44 }
  0xad   : > { %4094 = vmatmul.mubr.msk.f32.gmra.mrb[10].mxu0 %vm374_vm0, %v354_v44  ;;  %4136 = vmatprep.mubr.msk.f32.mxu1 %vm374_vm0, %v355_v45 }
  0xae   : > { %4096 = vmatprep.mubr.msk.f32.mxu0 %vm374_vm0, %v355_v45 }
  0xb0   : > { %4137 = vmatmul.mubr.msk.f32.gmra.mrb[12].mxu1 %vm374_vm0, %v356_v46 }
  0xb1   : > { %4097 = vmatmul.mubr.msk.f32.gmra.mrb[12].mxu0 %vm374_vm0, %v356_v46  ;;  %4139 = vmatprep.mubr.msk.f32.mxu1 %vm374_vm0, %v357_v47 }
  0xb2   : > { %4099 = vmatprep.mubr.msk.f32.mxu0 %vm374_vm0, %v357_v47 }
  0xb4   : > { %4140 = vmatmul.mubr.msk.f32.gmra.mrb[14].mxu1 %vm374_vm0, %v358_v48 }
  0xb5   : > { %4100 = vmatmul.mubr.msk.f32.gmra.mrb[14].mxu0 %vm374_vm0, %v358_v48  ;;  %4184 = vmatprep.mubr.msk.f32.mxu1 %vm4830_vm1, %v4829_v52 }
  0xb6   : > { %4158 = vmatprep.mubr.msk.f32.mxu0 %vm374_vm0, %v5100_v17 }
  0xb9   : > { %4159 = vmatmul.mubr.msk.f32.vlgmr.msra.gmra.mrb[16].mxu0 %vm374_vm0, %v344_v30 }
  0xba   : > { %4161 = vmatprep.mubr.msk.f32.mxu0 %vm374_vm0, %v345_v31 }
  0xbd   : > { %4162 = vmatmul.mubr.msk.f32.gmra.mrb[18].mxu0 %vm374_vm0, %v346_v35 }
  0xbe   : > { %4164 = vmatprep.mubr.msk.f32.mxu0 %vm374_vm0, %v347_v36 }
  0xc1   : > { %4165 = vmatmul.mubr.msk.f32.gmra.mrb[20].mxu0 %vm374_vm0, %v348_v38 }
  0xc2   : > { %4167 = vmatprep.mubr.msk.f32.mxu0 %vm374_vm0, %v349_v39 }
  0xc5   : > { %4168 = vmatmul.mubr.msk.f32.gmra.mrb[22].mxu0 %vm374_vm0, %v350_v40 }
  0xc6   : > { %4170 = vmatprep.mubr.msk.f32.mxu0 %vm374_vm0, %v351_v41 }
  0xc9   : > { %4171 = vmatmul.mubr.msk.f32.gmra.mrb[24].mxu0 %vm374_vm0, %v352_v42 }
  0xca   : > { %4173 = vmatprep.mubr.msk.f32.mxu0 %vm374_vm0, %v353_v43 }
  0xcd   : > { %4174 = vmatmul.mubr.msk.f32.gmra.mrb[26].mxu0 %vm374_vm0, %v354_v44 }
  0xce   : > { %4176 = vmatprep.mubr.msk.f32.mxu0 %vm374_vm0, %v355_v45 }
  0xd1   : > { %4177 = vmatmul.mubr.msk.f32.gmra.mrb[28].mxu0 %vm374_vm0, %v356_v46 }
  0xd2   : > { %4179 = vmatprep.mubr.msk.f32.mxu0 %vm374_vm0, %v357_v47 }
  0xd5   : > { %4180 = vmatmul.mubr.msk.f32.gmra.mrb[30].mxu0 %vm374_vm0, %v358_v48 }
  0xd6   : > { %4224 = vmatprep.mubr.msk.f32.mxu0 %vm4830_vm1, %v4829_v52 }
 0x16b   : > { %v4120_v54 = vpop.f32.mrb[0].mxu1 }
 0x16c   : > { %v729_v56 = vpop.f32.mrb[1].mxu1  ;;  %v4080_v57 = vpop.f32.mrb[0].mxu0  ;;  %v5191_v61 = vadd.f32 %v4120_v54, %v5177_v53 }
 0x16d   : > { %v5185_v58 = vadd.f32 %v5177_v53, %v729_v56  ;;  %v489_v59 = vpop.f32.mrb[1].mxu0  ;;  %v5196_v4 = vadd.f32 %v4080_v57, %v5182_v55 }
 0x16e   : > { %v5188_v60 = vadd.f32 %v5182_v55, %v489_v59  ;;  %v826_v6 = vmul.f32 1.442695, %v5191_v61  ;;  %vm809_vm2 = vcmp.gt.f32.partialorder %v5191_v61, 0.0 }
 0x16f   : > { %v824_v62 = vmul.f32 1.442695, %v5185_v58  ;;  %v4123_v63 = vpop.f32.mrb[2].mxu1  ;;  %v586_v13 = vmul.f32 1.442695, %v5196_v4  ;;  %vm808_vm3 = vcmp.gt.f32.partialorder %v5185_v58, 0.0 }
 0x170   : > { %v4083_v0 = vpop.f32.mrb[2].mxu0  ;;  %v584_v1 = vmul.f32 1.442695, %v5188_v60  ;;  %v739_v2 = vpop.f32.mrb[3].mxu1  ;;  %v5203_v9 = vadd.f32 %v4123_v63, %v5177_v53  ;;  %vm568_vm4 = vcmp.gt.f32.partialorder %v5188_v60, 0.0  ;;  %vm569_vm5 = vcmp.gt.f32.partialorder %v5196_v4, 0.0 }
 0x171   : > { %v499_v3 = vpop.f32.mrb[3].mxu0  ;;  %4473 = vpow2.f32 %v824_v62  ;;  %v5200_v7 = vadd.f32 %v5177_v53, %v739_v2  ;;  %v5206_v11 = vadd.f32 %v4083_v0, %v5182_v55 }
 0x172   : > { %4475 = vpow2.f32 %v584_v1  ;;  %v5214_v17 = vadd.f32 %v5182_v55, %v499_v3  ;;  %v830_v20 = vmul.f32 1.442695, %v5203_v9  ;;  %vm811_vm6 = vcmp.gt.f32.partialorder %v5203_v9, 0.0 }
 0x173   : > { %v4126_v5 = vpop.f32.mrb[4].mxu1  ;;  %4477 = vpow2.f32 %v826_v6  ;;  %v828_v16 = vmul.f32 1.442695, %v5200_v7  ;;  %v590_v23 = vmul.f32 1.442695, %v5206_v11  ;;  %vm810_vm7 = vcmp.gt.f32.partialorder %v5200_v7, 0.0 }
 0x174   : > { %v749_v8 = vpop.f32.mrb[5].mxu1  ;;  %v4086_v10 = vpop.f32.mrb[4].mxu0  ;;  %v5210_v14 = vadd.f32 %v4126_v5, %v5177_v53  ;;  %4479 = vpow2.f32 %v586_v13  ;;  %v588_v27 = vmul.f32 1.442695, %v5214_v17  ;;  %vm571_vm8 = vcmp.gt.f32.partialorder %v5206_v11, 0.0 }
 0x175   : > { %v509_v12 = vpop.f32.mrb[5].mxu0  ;;  %v5218_v21 = vadd.f32 %v5177_v53, %v749_v8  ;;  %v5225_v25 = vadd.f32 %v4086_v10, %v5182_v55  ;;  %4481 = vpow2.f32 %v828_v16  ;;  %vm570_vm9 = vcmp.gt.f32.partialorder %v5214_v17, 0.0 }
 0x176   : > { %v834_v24 = vmul.f32 1.442695, %v5210_v14  ;;  %4483 = vpow2.f32 %v830_v20  ;;  %v5235_v34 = vadd.f32 %v5182_v55, %v509_v12  ;;  %vm813_vm13 = vcmp.gt.f32.partialorder %v5210_v14, 0.0 }
 0x177   : > { %v4129_v15 = vpop.f32.mrb[6].mxu1  ;;  %v832_v30 = vmul.f32 1.442695, %v5218_v21  ;;  %4485 = vpow2.f32 %v590_v23  ;;  %v594_v36 = vmul.f32 1.442695, %v5225_v25  ;;  %vm812_vm10 = vcmp.gt.f32.partialorder %v5218_v21, 0.0 }
 0x178   : > { %v759_v18 = vpop.f32.mrb[7].mxu1  ;;  %v4089_v19 = vpop.f32.mrb[6].mxu0  ;;  %4487 = vpow2.f32 %v834_v24  ;;  %v5242_v38 = vadd.f32 %v4129_v15, %v5177_v53  ;;  %v592_v48 = vmul.f32 1.442695, %v5235_v34  ;;  %vm572_vm11 = vcmp.gt.f32.partialorder %v5235_v34, 0.0 }
 0x179   : > { %v5220_v22 = vpop.f32.mrb[7].mxu0  ;;  %4489 = vpow2.f32 %v588_v27  ;;  %v5252_v47 = vadd.f32 %v5177_v53, %v759_v18  ;;  %v5257_v50 = vadd.f32 %v4089_v19, %v5182_v55  ;;  %vm573_vm15 = vcmp.gt.f32.partialorder %v5225_v25, 0.0 }
 0x17a   : > { %4491 = vpow2.f32 %v832_v30  ;;  %v838_v57 = vmul.f32 1.442695, %v5242_v38  ;;  %v5283_v15 = vadd.f32 %v5182_v55, %v5220_v22 }
 0x17b   : > { %v4132_v26 = vpop.f32.mrb[8].mxu1  ;;  %v4474_v33 = vpop.eup %4473  ;;  %4493 = vpow2.f32 %v594_v36  ;;  %v836_v8 = vmul.f32 1.442695, %v5252_v47  ;;  %v598_v13 = vmul.f32 1.442695, %v5257_v50 }
 0x17c   : > { %v769_v28 = vpop.f32.mrb[9].mxu1  ;;  %v5228_v29 = vpop.f32.mrb[8].mxu0  ;;  %v3870_v43 = vadd.f32 -1.0, %v4474_v33 }
 0x17d   : > { %v5232_v31 = vadd.f32 %v5177_v53, %v769_v28  ;;  %v529_v32 = vpop.f32.mrb[9].mxu0  ;;  %v4476_v35 = vpop.eup %4475 }
 0x17e   : > { %v5245_v39 = vadd.f32 %v5182_v55, %v529_v32  ;;  %v4478_v45 = vpop.eup %4477  ;;  %v3837_v46 = vadd.f32 -1.0, %v4476_v35  ;;  %v872_v51 = vsel %vm808_vm3, %v5185_v58, %v3870_v43  ;;  %v5273_v58 = vadd.f32 %v4132_v26, %v5177_v53 }
 0x17f   : > { %v5238_v37 = vpop.f32.mrb[10].mxu1  ;;  %v840_v42 = vmul.f32 1.442695, %v5232_v31  ;;  %4183 = vmatpush3.xpose.msra.mxu1 %v872_v51  ;;  %v4480_v0 = vpop.eup %4479  ;;  %v3871_v2 = vadd.f32 -1.0, %v4478_v45  ;;  %v596_v35 = vmul.f32 1.442695, %v5283_v15 }
 0x180   : > { %v779_v40 = vpop.f32.mrb[11].mxu1  ;;  %v5247_v41 = vpop.f32.mrb[10].mxu0  ;;  %v600_v49 = vmul.f32 1.442695, %v5245_v39  ;;  %4187 = vmatprep.subr.mxu1 %v4829_v52  ;;  %v632_v6 = vsel %vm568_vm4, %v5188_v60, %v3837_v46  ;;  %v3838_v20 = vadd.f32 -1.0, %v4480_v0  ;;  %vm816_vm12 = vcmp.gt.f32.partialorder %v5232_v31, 0.0 }
 0x181   : > { %v539_v44 = vpop.f32.mrb[11].mxu0  ;;  %v5261_v54 = vadd.f32 %v5177_v53, %v779_v40  ;;  %v4482_v5 = vpop.eup %4481  ;;  %v873_v16 = vsel %vm809_vm2, %v5191_v61, %v3871_v2  ;;  %v842_v61 = vmul.f32 1.442695, %v5273_v58  ;;  %vm576_vm14 = vcmp.gt.f32.partialorder %v5245_v39, 0.0 }
 0x182   : > { %4495 = vpow2.f32 %v600_v49  ;;  %v5268_v59 = vadd.f32 %v5182_v55, %v539_v44  ;;  %v4484_v12 = vpop.eup %4483  ;;  %4185 = vmatmul.mubr.f32.vlgmr.msra.gmra.mrb[16].mxu1 %v632_v6  ;;  %v3872_v27 = vadd.f32 -1.0, %v4482_v5  ;;  %v633_v36 = vsel %vm569_vm5, %v5196_v4, %v3838_v20 }
 0x183   : > { %v5263_v56 = vpop.f32.mrb[12].mxu1  ;;  %4497 = vpow2.f32 %v840_v42  ;;  %v844_v1 = vmul.f32 1.442695, %v5261_v54  ;;  %v4486_v60 = vpop.eup %4485  ;;  %4188 = vmatpush3.xpose.msra.mxu1 %v873_v16  ;;  %4189 = vmatprep.mubr.msk.f32.mxu1 %vm4830_vm1, %v4829_v52  ;;  %v5316_v42 = vadd.f32 %v5228_v29, %v5182_v55  ;;  %v3873_v29 = vadd.f32 -1.0, %v4484_v12 }
 0x184   : > { %v789_v62 = vpop.f32.mrb[13].mxu1  ;;  %v5270_v63 = vpop.f32.mrb[12].mxu0  ;;  %4499 = vpow2.f32 %v592_v48  ;;  %v604_v10 = vmul.f32 1.442695, %v5268_v59  ;;  %4192 = vmatprep.subr.mxu1 %v4829_v52  ;;  %v874_v43 = vsel %vm810_vm7, %v5200_v7, %v3872_v27  ;;  %vm818_vm2 = vcmp.gt.f32.partialorder %v5261_v54, 0.0 }
 0x185   : > { %v549_v3 = vpop.f32.mrb[13].mxu0  ;;  %4501 = vpow2.f32 %v844_v1  ;;  %v5292_v19 = vadd.f32 %v5177_v53, %v789_v62  ;;  %v5298_v24 = vpop.eup %4487  ;;  %v5339_v62 = vadd.f32 %v5238_v37, %v5177_v53  ;;  %v3840_v1 = vadd.f32 -1.0, %v4486_v60 }
 0x186   : > { %4503 = vpow2.f32 %v838_v57  ;;  %v5303_v26 = vadd.f32 %v5182_v55, %v549_v3  ;;  %v4490_v30 = vpop.eup %4489  ;;  %4190 = vmatmul.mubr.f32.vlgmr.msra.gmra.mrb[18].mxu1 %v633_v36  ;;  %v602_v57 = vmul.f32 1.442695, %v5316_v42  ;;  %v875_v6 = vsel %vm811_vm6, %v5203_v9, %v3873_v29 }
 0x187   : > { %v5288_v18 = vpop.f32.mrb[14].mxu1  ;;  %4505 = vpow2.f32 %v604_v10  ;;  %v848_v32 = vmul.f32 1.442695, %v5292_v19  ;;  %v4492_v33 = vpop.eup %4491  ;;  %4193 = vmatpush3.xpose.msra.mxu1 %v874_v43  ;;  %4194 = vmatprep.mubr.msk.f32.mxu1 %vm4830_vm1, %v4829_v52  ;;  %v3839_v45 = vadd.f32 -1.0, %v4490_v30  ;;  %v5353_v37 = vadd.f32 %v5247_v41, %v5182_v55 }
 0x188   : > { %v799_v22 = vpop.f32.mrb[15].mxu1  ;;  %v5296_v23 = vpop.f32.mrb[14].mxu0  ;;  %4507 = vpow2.f32 %v836_v8  ;;  %v608_v40 = vmul.f32 1.442695, %v5303_v26  ;;  %4197 = vmatprep.subr.mxu1 %v4829_v52  ;;  %v5361_v9 = vadd.f32 %v5263_v56, %v5177_v53  ;;  %v846_v16 = vmul.f32 1.442695, %v5339_v62 }
 0x189   : > { %v559_v28 = vpop.f32.mrb[15].mxu0  ;;  %4509 = vpow2.f32 %v598_v13  ;;  %v5319_v44 = vpop.eup %4493  ;;  %v5323_v4 = vadd.f32 %v5177_v53, %v799_v22  ;;  %v634_v0 = vsel %vm570_vm9, %v5214_v17, %v3839_v45  ;;  %v3874_v17 = vadd.f32 -1.0, %v4492_v33 }
 0x18a   : > { %4511 = vpow2.f32 %v848_v32  ;;  %v5330_v7 = vadd.f32 %v5182_v55, %v559_v28  ;;  %4195 = vmatmul.mubr.f32.vlgmr.msra.gmra.mrb[20].mxu1 %v634_v0  ;;  %v635_v60 = vsel %vm571_vm8, %v5206_v11, %v3840_v1  ;;  %v3875_v28 = vadd.f32 -1.0, %v5298_v24 }
 0x18b   : > { %4513 = vpow2.f32 %v842_v61  ;;  %v852_v49 = vmul.f32 1.442695, %v5323_v4  ;;  %4198 = vmatpush3.xpose.msra.mxu1 %v875_v6  ;;  %4199 = vmatprep.mubr.msk.f32.mxu1 %vm4830_vm1, %v4829_v52  ;;  %v876_v27 = vsel %vm812_vm10, %v5218_v21, %v3874_v17  ;;  %vm578_vm3 = vcmp.gt.f32.partialorder %v5268_v59, 0.0 }
 0x18c   : > { %v4496_v46 = vpop.eup %4495  ;;  %4515 = vpow2.f32 %v608_v40  ;;  %v612_v5 = vmul.f32 1.442695, %v5330_v7  ;;  %4202 = vmatprep.subr.mxu1 %v4829_v52  ;;  %v850_v21 = vmul.f32 1.442695, %v5361_v9  ;;  %vm820_vm4 = vcmp.gt.f32.partialorder %v5292_v19, 0.0 }
 0x18d   : > { %v4498_v48 = vpop.eup %4497  ;;  %4517 = vpow2.f32 %v596_v35  ;;  %v3845_v3 = vadd.f32 -1.0, %v4496_v46  ;;  %v5393_v24 = vadd.f32 %v5270_v63, %v5182_v55  ;;  %v3842_v40 = vadd.f32 -1.0, %v5319_v44 }
 0x18e   : > { %v4500_v51 = vpop.eup %4499  ;;  %4519 = vpow2.f32 %v852_v49  ;;  %v3878_v10 = vadd.f32 -1.0, %v4498_v48  ;;  %4200 = vmatmul.mubr.f32.vlgmr.msra.gmra.mrb[22].mxu1 %v635_v60  ;;  %v877_v43 = vsel %vm813_vm13, %v5210_v14, %v3875_v28  ;;  %vm814_vm5 = vcmp.gt.f32.partialorder %v5252_v47, 0.0 }
 0x18f   : > { %v4502_v2 = vpop.eup %4501  ;;  %4521 = vpow2.f32 %v612_v5  ;;  %v3841_v22 = vadd.f32 -1.0, %v4500_v51  ;;  %v640_v56 = vsel %vm576_vm14, %v5245_v39, %v3845_v3  ;;  %4203 = vmatpush3.xpose.msra.mxu1 %v876_v27  ;;  %4204 = vmatprep.mubr.msk.f32.mxu1 %vm4830_vm1, %v4829_v52  ;;  %vm580_vm6 = vcmp.gt.f32.partialorder %v5303_v26, 0.0  ;;  %v4160_v27 = vpop.f32.mrb[16].mxu0 }
 0x190   : > { %v5348_v8 = vpop.eup %4503  ;;  %v3880_v41 = vadd.f32 -1.0, %v4502_v2  ;;  %v880_v20 = vsel %vm816_vm12, %v5232_v31, %v3878_v10  ;;  %4523 = vpow2.f32 %v602_v57  ;;  %v606_v31 = vmul.f32 1.442695, %v5353_v37  ;;  %4207 = vmatprep.subr.mxu1 %v4829_v52 }
 0x191   : > { %v4506_v12 = vpop.eup %4505  ;;  %4223 = vmatpush3.xpose.msra.mxu0 %v880_v20  ;;  %4525 = vpow2.f32 %v846_v16  ;;  %v636_v36 = vsel %vm572_vm11, %v5235_v34, %v3841_v22  ;;  %v610_v44 = vmul.f32 1.442695, %v5393_v24  ;;  %vm822_vm7 = vcmp.gt.f32.partialorder %v5323_v4, 0.0 }
 0x192   : > { %v4508_v13 = vpop.eup %4507  ;;  %v3847_v11 = vadd.f32 -1.0, %v4506_v12  ;;  %v882_v39 = vsel %vm818_vm2, %v5261_v54, %v3880_v41  ;;  %4232 = vmatprep.subr.mxu0 %v4829_v52  ;;  %v5399_v54 = vadd.f32 %v5288_v18, %v5177_v53  ;;  %4205 = vmatmul.mubr.f32.vlgmr.msra.gmra.mrb[24].mxu1 %v636_v36  ;;  %4527 = vpow2.f32 %v606_v31 }
 0x193   : > { %v5371_v61 = vpop.eup %4509  ;;  %v3876_v53 = vadd.f32 -1.0, %v4508_v13  ;;  %4208 = vmatpush3.xpose.msra.mxu1 %v877_v43  ;;  %4209 = vmatprep.mubr.msk.f32.mxu1 %vm4830_vm1, %v4829_v52  ;;  %4529 = vpow2.f32 %v850_v21  ;;  %vm574_vm8 = vcmp.gt.f32.partialorder %v5283_v15, 0.0  ;;  %vm582_vm9 = vcmp.gt.f32.partialorder %v5330_v7, 0.0 }
 0x194   : > { %v4512_v30 = vpop.eup %4511  ;;  %4225 = vmatmul.mubr.f32.vlgmr.msra.gmra.mrb[32].mxu0 %v640_v56  ;;  %v642_v45 = vsel %vm578_vm3, %v5268_v59, %v3847_v11  ;;  %v5422_v59 = vadd.f32 %v5296_v23, %v5182_v55  ;;  %4212 = vmatprep.subr.mxu1 %v4829_v52  ;;  %v854_v46 = vmul.f32 1.442695, %v5399_v54  ;;  %4531 = vpow2.f32 %v610_v44  ;;  %v3886_v56 = vld [vmem:[%s5858_s6] ss:$0 sm:$0xff] }
 0x195   : > { %v5387_v32 = vpop.eup %4513  ;;  %v3882_v33 = vadd.f32 -1.0, %v4512_v30  ;;  %4233 = vmatpush3.xpose.msra.mxu0 %v882_v39  ;;  %4234 = vmatprep.mubr.msk.f32.mxu0 %vm4830_vm1, %v4829_v52  ;;  %v878_v55 = vsel %vm814_vm5, %v5252_v47, %v3876_v53  ;;  %vm815_vm10 = vcmp.gt.f32.partialorder %v5242_v38, 0.0  ;;  %vm575_vm11 = vcmp.gt.f32.partialorder %v5257_v50, 0.0  ;;  %v969_v30 = vpop.f32.mrb[17].mxu0 }
 0x196   : > { %v4516_v35 = vpop.eup %4515  ;;  %4242 = vmatprep.subr.mxu0 %v4829_v52  ;;  %v614_v47 = vmul.f32 1.442695, %v5422_v59  ;;  %4533 = vpow2.f32 %v854_v46  ;;  %v3879_v3 = vadd.f32 -1.0, %v5387_v32  ;;  %vm817_vm12 = vcmp.gt.f32.partialorder %v5273_v58, 0.0  ;;  %v4163_v39 = vpop.f32.mrb[18].mxu0 }
 0x197   : > { %v4518_v63 = vpop.eup %4517  ;;  %v3849_v18 = vadd.f32 -1.0, %v4516_v35  ;;  %v884_v14 = vsel %vm820_vm4, %v5292_v19, %v3882_v33  ;;  %v637_v19 = vsel %vm573_vm15, %v5225_v25, %v3842_v40  ;;  %v3877_v25 = vadd.f32 -1.0, %v5348_v8  ;;  %v979_v32 = vpop.f32.mrb[19].mxu0 }
 0x198   : > { %v4520_v34 = vpop.eup %4519  ;;  %4235 = vmatmul.mubr.f32.vlgmr.msra.gmra.mrb[34].mxu0 %v642_v45  ;;  %v3843_v29 = vadd.f32 -1.0, %v4518_v63  ;;  %4210 = vmatmul.mubr.f32.vlgmr.msra.gmra.mrb[26].mxu1 %v637_v19  ;;  %4535 = vpow2.f32 %v614_v47  ;;  %vm577_vm13 = vcmp.gt.f32.partialorder %v5316_v42, 0.0  ;;  %v881_v8 = vsel %vm817_vm12, %v5273_v58, %v3879_v3  ;;  %v4166_v21 = vpop.f32.mrb[20].mxu0 }
 0x199   : > { %v3884_v48 = vadd.f32 -1.0, %v4520_v34  ;;  %v4522_v49 = vpop.eup %4521  ;;  %4243 = vmatpush3.xpose.msra.mxu0 %v884_v14  ;;  %v644_v23 = vsel %vm580_vm6, %v5303_v26, %v3849_v18  ;;  %4213 = vmatpush3.xpose.msra.mxu1 %v878_v55  ;;  %v879_v1 = vsel %vm815_vm10, %v5242_v38, %v3877_v25  ;;  %vm819_vm14 = vcmp.gt.f32.partialorder %v5339_v62, 0.0  ;;  %v989_v35 = vpop.f32.mrb[21].mxu0 }
 0x19a   : > { %4214 = vmatprep.mubr.msk.f32.mxu1 %vm4830_vm1, %v4829_v52  ;;  %v3851_v57 = vadd.f32 -1.0, %v4522_v49  ;;  %4244 = vmatprep.mubr.msk.f32.mxu0 %vm4830_vm1, %v4829_v52  ;;  %v4524_v26 = vpop.eup %4523  ;;  %v638_v0 = vsel %vm574_vm8, %v5283_v15, %v3843_v29  ;;  %vm579_vm15 = vcmp.gt.f32.partialorder %v5353_v37, 0.0  ;;  %vm821_vm2 = vcmp.gt.f32.partialorder %v5361_v9, 0.0 }
 0x19b   : > { %v886_v51 = vsel %vm822_vm7, %v5323_v4, %v3884_v48  ;;  %4217 = vmatprep.subr.mxu1 %v4829_v52  ;;  %4252 = vmatprep.subr.mxu0 %v4829_v52  ;;  %v3844_v4 = vadd.f32 -1.0, %v5371_v61  ;;  %v4526_v5 = vpop.eup %4525  ;;  %vm581_vm3 = vcmp.gt.f32.partialorder %v5393_v24, 0.0  ;;  %vm823_vm4 = vcmp.gt.f32.partialorder %v5399_v54, 0.0 }
 0x19c   : > { %4245 = vmatmul.mubr.f32.vlgmr.msra.gmra.mrb[36].mxu0 %v644_v23  ;;  %4215 = vmatmul.mubr.f32.vlgmr.msra.gmra.mrb[28].mxu1 %v638_v0  ;;  %v646_v2 = vsel %vm582_vm9, %v5330_v7, %v3851_v57  ;;  %v4528_v38 = vpop.eup %4527  ;;  %v3846_v7 = vadd.f32 -1.0, %v4524_v26  ;;  %v3881_v17 = vadd.f32 -1.0, %v4526_v5  ;;  %vm583_vm5 = vcmp.gt.f32.partialorder %v5422_v59, 0.0 }
 0x19d   : > { %4253 = vmatpush3.xpose.msra.mxu0 %v886_v51  ;;  %4218 = vmatpush3.xpose.msra.mxu1 %v879_v1  ;;  %v639_v15 = vsel %vm575_vm11, %v5257_v50, %v3844_v4  ;;  %v4530_v6 = vpop.eup %4529  ;;  %v3848_v10 = vadd.f32 -1.0, %v4528_v38  ;;  %v975_v28 = vadd.f32 %v4160_v27, %v3886_v56  ;;  %v970_v31 = vadd.f32 %v3886_v56, %v969_v30 }
 0x19e   : > { %4219 = vmatprep.mubr.msk.f32.mxu1 %vm4830_vm1, %v4829_v52  ;;  %4254 = vmatprep.mubr.msk.f32.mxu0 %vm4830_vm1, %v4829_v52  ;;  %v641_v50 = vsel %vm577_vm13, %v5316_v42, %v3846_v7  ;;  %v4532_v12 = vpop.eup %4531  ;;  %v883_v58 = vsel %vm819_vm14, %v5339_v62, %v3881_v17  ;;  %v3883_v41 = vadd.f32 -1.0, %v4530_v6  ;;  %v5507_v33 = vadd.f32 %v3886_v56, %v979_v32 }
 0x19f   : > { %4227 = vmatprep.subr.mxu1 %v4829_v52  ;;  %4262 = vmatprep.subr.mxu0 %v4829_v52  ;;  %v643_v16 = vsel %vm579_vm15, %v5353_v37, %v3848_v10  ;;  %v3850_v42 = vadd.f32 -1.0, %v4532_v12  ;;  %4537 = vtanh.f32 %v975_v28  ;;  %v5509_v63 = vadd.f32 %v4166_v21, %v3886_v56 }
 0x1a0   : > { %4255 = vmatmul.mubr.f32.vlgmr.msra.gmra.mrb[38].mxu0 %v646_v2  ;;  %4220 = vmatmul.mubr.f32.vlgmr.msra.gmra.mrb[30].mxu1 %v639_v15  ;;  %v4534_v13 = vpop.eup %4533  ;;  %v885_v20 = vsel %vm821_vm2, %v5361_v9, %v3883_v41  ;;  %4539 = vtanh.f32 %v970_v31  ;;  %v5511_v43 = vadd.f32 %v3886_v56, %v989_v35  ;;  %vm2200_vm6 = vcmask 64512  }
 0x1a1   : > { %4264 = vmatprep.mubr.msk.f32.mxu0 %vm4830_vm1, %v4829_v52  ;;  %4228 = vmatpush3.xpose.msra.mxu1 %v881_v8  ;;  %v3885_v62 = vadd.f32 -1.0, %v4534_v13  ;;  %v645_v22 = vsel %vm581_vm3, %v5393_v24, %v3850_v42  ;;  %v5505_v24 = vadd.f32 %v4163_v39, %v3886_v56 }
 0x1a2   : > { %4229 = vmatprep.mubr.msk.f32.mxu1 %vm4830_vm1, %v4829_v52  ;;  %4237 = vmatprep.subr.mxu1 %v4829_v52  ;;  %v4536_v60 = vpop.eup %4535 }
 0x1a3   : > { %v3852_v61 = vadd.f32 -1.0, %v4536_v60  ;;  %v887_v37 = vsel %vm823_vm4, %v5399_v54, %v3885_v62  ;;  %v4169_v54 = vpop.f32.mrb[22].mxu0  ;;  %4541 = vtanh.f32 %v5505_v24 }
 0x1a4   : > { %4230 = vmatmul.mubr.f32.vlgmr.msra.gmra.mrb[32].mxu1 %v641_v50  ;;  %v999_v36 = vpop.f32.mrb[23].mxu0  ;;  %v5513_v44 = vadd.f32 %v4169_v54, %v3886_v56 }
 0x1a5   : > { %4238 = vmatpush3.xpose.msra.mxu1 %v883_v58  ;;  %4239 = vmatprep.mubr.msk.f32.mxu1 %vm4830_vm1, %v4829_v52  ;;  %v647_v9 = vsel %vm583_vm5, %v5422_v59, %v3852_v61  ;;  %v4172_v40 = vpop.f32.mrb[24].mxu0  ;;  %v5515_v59 = vadd.f32 %v3886_v56, %v999_v36 }
 0x1a6   : > { %4247 = vmatprep.subr.mxu1 %v4829_v52  ;;  %v1009_v45 = vpop.f32.mrb[25].mxu0  ;;  %v5518_v48 = vadd.f32 %v4172_v40, %v3886_v56 }
 0x1a7   : > { %v4175_v53 = vpop.f32.mrb[26].mxu0  ;;  %v5520_v49 = vadd.f32 %v3886_v56, %v1009_v45 }
 0x1a8   : > { %4240 = vmatmul.mubr.f32.vlgmr.msra.gmra.mrb[34].mxu1 %v643_v16  ;;  %v1019_v18 = vpop.f32.mrb[27].mxu0  ;;  %v5522_v55 = vadd.f32 %v4175_v53, %v3886_v56 }
 0x1a9   : > { %4248 = vmatpush3.xpose.msra.mxu1 %v885_v20  ;;  %4249 = vmatprep.mubr.msk.f32.mxu1 %vm4830_vm1, %v4829_v52  ;;  %v4538_v11 = vpop.eup %4537  ;;  %v4178_v14 = vpop.f32.mrb[28].mxu0  ;;  %v5524_v23 = vadd.f32 %v3886_v56, %v1019_v18 }
 0x1aa   : > { %4257 = vmatprep.subr.mxu1 %v4829_v52  ;;  %v4540_v34 = vpop.eup %4539  ;;  %v1029_v46 = vpop.f32.mrb[29].mxu0  ;;  %v5526_v25 = vadd.f32 %v4178_v14, %v3886_v56 }
 0x1ab   : > { %v4181_v19 = vpop.f32.mrb[30].mxu0  ;;  %4263 = vmatpush3.msra.mxu0 %v4540_v34  ;;  %v5528_v51 = vadd.f32 %v3886_v56, %v1029_v46 }
 0x1ac   : > { %4250 = vmatmul.mubr.f32.vlgmr.msra.gmra.mrb[36].mxu1 %v645_v22  ;;  %v1039_v29 = vpop.f32.mrb[31].mxu0  ;;  %4272 = vmatprep.subr.mxu0 %v4829_v52  ;;  %v5530_v57 = vadd.f32 %v4181_v19, %v3886_v56 }
 0x1ad   : > { %4258 = vmatpush3.xpose.msra.mxu1 %v887_v37  ;;  %4259 = vmatprep.mubr.msk.f32.mxu1 %vm4830_vm1, %v4829_v52  ;;  %v5532_v47 = vadd.f32 %v3886_v56, %v1039_v29 }
 0x1ae   : > { %4267 = vmatprep.subr.mxu1 %v4829_v52 }
 0x1b0   : > { %4260 = vmatmul.mubr.f32.vlgmr.msra.gmra.mrb[38].mxu1 %v647_v9 }
 0x1b1   : > { %4269 = vmatprep.mubr.msk.f32.mxu1 %vm4830_vm1, %v4829_v52  ;;  %4268 = vmatpush3.msra.mxu1 %v4538_v11 }
 0x1b2   : > { %4277 = vmatprep.subr.mxu1 %v4829_v52 }
 0x255   : > { %v1130_v26 = vpop.f32.mrb[16].mxu1 }
 0x256   : > { %v2184_v0 = vmul.f32 0.25, %v1130_v26  ;;  %v4186_v4 = vpop.f32.mrb[17].mxu1 }
 0x258   : > { %v2201_v1 = vsel %vm2200_vm6, %v2184_v0, -inf }
 0x259   : > { %v2202_v2 = vrot.slane %v2201_v1, 4  ;;  %v1200_v3 = vpop.f32.mrb[18].mxu1 }
 0x25a   : > { %v2185_v38 = vmul.f32 0.25, %v1200_v3  ;;  %v4191_v15 = vpop.f32.mrb[19].mxu1 }
 0x25b   : > { %v2203_v5 = vmax.f32 %v2201_v1, %v2202_v2 }
 0x25c   : > { %v2208_v6 = vsel %vm2200_vm6, %v2185_v38, -inf }
 0x25d   : > { %v2204_v7 = vrot.slane %v2203_v5, 2  ;;  %v2209_v8 = vrot.slane %v2208_v6, 4  ;;  %v1270_v50 = vpop.f32.mrb[20].mxu1 }
 0x25e   : > { %v5536_v12 = vmul.f32 0.25, %v1270_v50  ;;  %v4196_v58 = vpop.f32.mrb[21].mxu1 }
 0x25f   : > { %v2205_v17 = vmax.f32 %v2203_v5, %v2204_v7  ;;  %v2210_v10 = vmax.f32 %v2208_v6, %v2209_v8 }
 0x260   : > { %v2215_v16 = vsel %vm2200_vm6, %v5536_v12, -inf }
 0x261   : > { %v2206_v41 = vrot.slane %v2205_v17, 1  ;;  %v2211_v13 = vrot.slane %v2210_v10, 2  ;;  %v2216_v60 = vrot.slane %v2215_v16, 4  ;;  %v1340_v20 = vpop.f32.mrb[22].mxu1 }
 0x262   : > { %v5540_v22 = vmul.f32 0.25, %v1340_v20  ;;  %v4201_v61 = vpop.f32.mrb[23].mxu1 }
 0x263   : > { %v2207_v42 = vmax.f32 %v2205_v17, %v2206_v41  ;;  %v2212_v62 = vmax.f32 %v2210_v10, %v2211_v13  ;;  %v2217_v9 = vmax.f32 %v2215_v16, %v2216_v60 }
 0x264   : > { %v2222_v27 = vsel %vm2200_vm6, %v5540_v22, -inf }
 0x265   : > { %v2313_v37 = vsub.f32 %v2184_v0, %v2207_v42  ;;  %v2213_v56 = vrot.slane %v2212_v62, 1  ;;  %v2218_v30 = vrot.slane %v2217_v9, 2  ;;  %v2223_v31 = vrot.slane %v2222_v27, 4  ;;  %v1410_v39 = vpop.f32.mrb[24].mxu1 }
 0x266   : > { %v5547_v35 = vmul.f32 0.25, %v1410_v39  ;;  %v4206_v54 = vpop.f32.mrb[25].mxu1 }
 0x267   : > { %v1690_v28 = vpop.f32.mrb[32].mxu0  ;;  %v2329_v11 = vmul.f32 1.442695, %v2313_v37  ;;  %v2214_v21 = vmax.f32 %v2212_v62, %v2213_v56  ;;  %v2219_v40 = vmax.f32 %v2217_v9, %v2218_v30  ;;  %v2224_v45 = vmax.f32 %v2222_v27, %v2223_v31 }
 0x268   : > { %v5544_v32 = vmul.f32 0.25, %v1690_v28  ;;  %v4226_v36 = vpop.f32.mrb[33].mxu0  ;;  %v2229_v14 = vsel %vm2200_vm6, %v5547_v35, -inf  ;;  %v5568_v28 = vpop.eup %4541 }
 0x269   : > { %4543 = vpow2.f32 %v2329_v11  ;;  %v2314_v18 = vsub.f32 %v2185_v38, %v2214_v21  ;;  %v2220_v24 = vrot.slane %v2219_v40, 1  ;;  %v2225_v19 = vrot.slane %v2224_v45, 2 }
 0x26a   : > { %v2257_v53 = vsel %vm2200_vm6, %v5544_v32, -inf  ;;  %4545 = vtanh.f32 %v5507_v33  ;;  %v2230_v29 = vrot.slane %v2229_v14, 4 }
 0x26b   : > { %v2258_v34 = vrot.slane %v2257_v53, 4  ;;  %v1830_v46 = vpop.f32.mrb[34].mxu0  ;;  %v1480_v26 = vpop.f32.mrb[26].mxu1  ;;  %4547 = vtanh.f32 %v5509_v63  ;;  %v2331_v1 = vmul.f32 1.442695, %v2314_v18  ;;  %v2221_v5 = vmax.f32 %v2219_v40, %v2220_v24 }
 0x26c   : > { %v5554_v0 = vmul.f32 0.25, %v1830_v46  ;;  %v4236_v4 = vpop.f32.mrb[35].mxu0  ;;  %v5557_v3 = vmul.f32 0.25, %v1480_v26  ;;  %v4211_v33 = vpop.f32.mrb[27].mxu1  ;;  %v2226_v38 = vmax.f32 %v2224_v45, %v2225_v19  ;;  %v2231_v15 = vmax.f32 %v2229_v14, %v2230_v29 }
 0x26d   : > { %v2259_v2 = vmax.f32 %v2257_v53, %v2258_v34  ;;  %4549 = vpow2.f32 %v2331_v1  ;;  %v2315_v63 = vsub.f32 %v5536_v12, %v2221_v5 }
 0x26e   : > { %v2271_v7 = vsel %vm2200_vm6, %v5554_v0, -inf  ;;  %v2236_v8 = vsel %vm2200_vm6, %v5557_v3, -inf  ;;  %v2227_v10 = vrot.slane %v2226_v38, 1  ;;  %v2232_v58 = vrot.slane %v2231_v15, 2 }
 0x26f   : > { %v2260_v6 = vrot.slane %v2259_v2, 2  ;;  %v2272_v17 = vrot.slane %v2271_v7, 4  ;;  %v1970_v50 = vpop.f32.mrb[36].mxu0  ;;  %v2237_v41 = vrot.slane %v2236_v8, 4  ;;  %v1550_v13 = vpop.f32.mrb[28].mxu1 }
 0x270   : > { %v4246_v16 = vpop.f32.mrb[37].mxu0  ;;  %v5564_v20 = vmul.f32 0.25, %v1550_v13  ;;  %v5566_v62 = vmul.f32 0.25, %v1970_v50  ;;  %v4216_v61 = vpop.f32.mrb[29].mxu1  ;;  %v2333_v37 = vmul.f32 1.442695, %v2315_v63  ;;  %v2228_v9 = vmax.f32 %v2226_v38, %v2227_v10 }
 0x271   : > { %v2261_v42 = vmax.f32 %v2259_v2, %v2260_v6  ;;  %v2273_v60 = vmax.f32 %v2271_v7, %v2272_v17  ;;  %v2233_v56 = vmax.f32 %v2231_v15, %v2232_v58  ;;  %v2238_v27 = vmax.f32 %v2236_v8, %v2237_v41 }
 0x272   : > { %v2243_v30 = vsel %vm2200_vm6, %v5564_v20, -inf  ;;  %v2285_v31 = vsel %vm2200_vm6, %v5566_v62, -inf  ;;  %4551 = vpow2.f32 %v2333_v37  ;;  %v2316_v54 = vsub.f32 %v5540_v22, %v2228_v9 }
 0x273   : > { %v2262_v11 = vrot.slane %v2261_v42, 1  ;;  %v2274_v12 = vrot.slane %v2273_v60, 2  ;;  %v2110_v39 = vpop.f32.mrb[38].mxu0  ;;  %v5574_v21 = vpop.eup %4543  ;;  %v2234_v36 = vrot.slane %v2233_v56, 1  ;;  %v2239_v40 = vrot.slane %v2238_v27, 2 }
 0x274   : > { %v1620_v45 = vpop.f32.mrb[30].mxu1  ;;  %v4256_v53 = vpop.f32.mrb[39].mxu0  ;;  %v2361_v14 = vsel %vm2200_vm6, %v5574_v21, 0.0  ;;  %v2244_v24 = vrot.slane %v2243_v30, 4  ;;  %v2335_v26 = vmul.f32 1.442695, %v2316_v54 }
 0x275   : > { %v5577_v18 = vpop.eup %4545  ;;  %v2263_v34 = vmax.f32 %v2261_v42, %v2262_v11  ;;  %v2275_v46 = vmax.f32 %v2273_v60, %v2274_v12  ;;  %v4221_v19 = vpop.f32.mrb[31].mxu1  ;;  %v2362_v29 = vrot.slane %v2361_v14, 4  ;;  %v2235_v4 = vmax.f32 %v2233_v56, %v2234_v36 }
 0x276   : > { %v2240_v1 = vmax.f32 %v2238_v27, %v2239_v40  ;;  %v5581_v2 = vpop.eup %4547  ;;  %v2245_v5 = vmax.f32 %v2243_v30, %v2244_v24  ;;  %v2286_v38 = vrot.slane %v2285_v31, 4  ;;  %4553 = vpow2.f32 %v2335_v26 }
 0x277   : > { %v2321_v22 = vsub.f32 %v5544_v32, %v2263_v34  ;;  %v2276_v33 = vrot.slane %v2275_v46, 1  ;;  %v2363_v15 = vadd.f32 %v2362_v29, %v2361_v14  ;;  %v2317_v7 = vsub.f32 %v5547_v35, %v2235_v4  ;;  %v1760_v8 = vpop.f32.mrb[32].mxu1  ;;  %v5585_v17 = vpop.eup %4549 }
 0x278   : > { %v2241_v6 = vrot.slane %v2240_v1, 1  ;;  %v2246_v10 = vrot.slane %v2245_v5, 2  ;;  %v2287_v58 = vmax.f32 %v2285_v31, %v2286_v38  ;;  %v4231_v41 = vpop.f32.mrb[33].mxu1  ;;  %v2368_v32 = vsel %vm2200_vm6, %v5585_v17, 0.0 }
 0x279   : > { %v2345_v50 = vmul.f32 1.442695, %v2321_v22  ;;  %v2277_v63 = vmax.f32 %v2275_v46, %v2276_v33  ;;  %v2364_v13 = vrot.slane %v2363_v15, 2  ;;  %v2337_v16 = vmul.f32 1.442695, %v2317_v7 }
 0x27a   : > { %v2242_v42 = vmax.f32 %v2240_v1, %v2241_v6  ;;  %v2369_v60 = vrot.slane %v2368_v32, 4  ;;  %v2247_v35 = vmax.f32 %v2245_v5, %v2246_v10  ;;  %v2288_v56 = vrot.slane %v2287_v58, 2 }
 0x27b   : > { %4555 = vpow2.f32 %v2345_v50  ;;  %v2323_v61 = vsub.f32 %v5554_v0, %v2277_v63  ;;  %v2365_v37 = vadd.f32 %v2364_v13, %v2363_v15  ;;  %v5591_v27 = vpop.f32.mrb[34].mxu1  ;;  %v5593_v31 = vmul.f32 0.25, %v1620_v45 }
 0x27c   : > { %4557 = vpow2.f32 %v2337_v16  ;;  %v2318_v9 = vsub.f32 %v5557_v3, %v2242_v42  ;;  %v2370_v11 = vadd.f32 %v2369_v60, %v2368_v32  ;;  %v2248_v30 = vrot.slane %v2247_v35, 1  ;;  %v4241_v54 = vpop.f32.mrb[35].mxu1  ;;  %v5595_v36 = vpop.eup %4551 }
 0x27d   : > { %v2349_v12 = vmul.f32 1.442695, %v2323_v61  ;;  %v2366_v40 = vrot.slane %v2365_v37, 1  ;;  %v2289_v14 = vmax.f32 %v2287_v58, %v2288_v56  ;;  %v5597_v0 = vmul.f32 0.25, %v2110_v39 }
 0x27e   : > { %v2339_v53 = vmul.f32 1.442695, %v2318_v9  ;;  %v2371_v34 = vrot.slane %v2370_v11, 2  ;;  %v2375_v3 = vsel %vm2200_vm6, %v5595_v36, 0.0  ;;  %v2249_v46 = vmax.f32 %v2247_v35, %v2248_v30 }
 0x27f   : > { %4559 = vpow2.f32 %v2349_v12  ;;  %v2367_v24 = vadd.f32 %v2366_v40, %v2365_v37  ;;  %v2376_v19 = vrot.slane %v2375_v3, 4  ;;  %v2290_v29 = vrot.slane %v2289_v14, 1  ;;  %v5601_v45 = vpop.f32.mrb[36].mxu1 }
 0x280   : > { %4561 = vpow2.f32 %v2339_v53  ;;  %v2372_v26 = vadd.f32 %v2371_v34, %v2370_v11  ;;  %v2319_v4 = vsub.f32 %v5564_v20, %v2249_v46  ;;  %v2250_v1 = vsel %vm2200_vm6, %v5593_v31, -inf  ;;  %v4251_v22 = vpop.f32.mrb[37].mxu1  ;;  %v5608_v33 = vpop.eup %4553 }
 0x281   : > { %v2299_v39 = vsel %vm2200_vm6, %v5597_v0, -inf  ;;  %4563 = vrcp.f32 %v2367_v24  ;;  %v2377_v5 = vadd.f32 %v2376_v19, %v2375_v3  ;;  %v2291_v38 = vmax.f32 %v2289_v14, %v2290_v29 }
 0x282   : > { %v2251_v15 = vrot.slane %v2250_v1, 4  ;;  %v2373_v7 = vrot.slane %v2372_v26, 1  ;;  %v2382_v6 = vsel %vm2200_vm6, %v5608_v33, 0.0  ;;  %v2341_v50 = vmul.f32 1.442695, %v2319_v4 }
 0x283   : > { %v2300_v63 = vrot.slane %v2299_v39, 4  ;;  %v2378_v20 = vrot.slane %v2377_v5, 2  ;;  %v2383_v10 = vrot.slane %v2382_v6, 4  ;;  %v2325_v58 = vsub.f32 %v5566_v62, %v2291_v38  ;;  %v5613_v13 = vpop.f32.mrb[38].mxu1 }
 0x284   : > { %v2252_v41 = vmax.f32 %v2250_v1, %v2251_v15  ;;  %4565 = vpow2.f32 %v2341_v50  ;;  %v5617_v42 = vmul.f32 0.25, %v1760_v8  ;;  %v4261_v60 = vpop.f32.mrb[39].mxu1  ;;  %v2374_v11 = vadd.f32 %v2373_v7, %v2372_v26 }
 0x285   : > { %v5615_v32 = vpop.eup %4555  ;;  %v2301_v16 = vmax.f32 %v2299_v39, %v2300_v63  ;;  %v2379_v35 = vadd.f32 %v2378_v20, %v2377_v5  ;;  %v2384_v37 = vadd.f32 %v2383_v10, %v2382_v6  ;;  %v2353_v56 = vmul.f32 1.442695, %v2325_v58 }
 0x286   : > { %v5619_v61 = vpop.eup %4557  ;;  %v2417_v9 = vsel %vm2200_vm6, %v5615_v32, 0.0  ;;  %v2253_v30 = vrot.slane %v2252_v41, 2  ;;  %v2264_v46 = vsel %vm2200_vm6, %v5617_v42, -inf }
 0x287   : > { %v2389_v62 = vsel %vm2200_vm6, %v5619_v61, 0.0  ;;  %v2418_v12 = vrot.slane %v2417_v9, 4  ;;  %v2380_v54 = vrot.slane %v2379_v35, 1  ;;  %v2385_v40 = vrot.slane %v2384_v37, 2 }
 0x288   : > { %v2390_v53 = vrot.slane %v2389_v62, 4  ;;  %4567 = vpow2.f32 %v2353_v56  ;;  %v2254_v34 = vmax.f32 %v2252_v41, %v2253_v30  ;;  %v2302_v3 = vrot.slane %v2301_v16, 2 }
 0x289   : > { %v5625_v8 = vpop.eup %4559  ;;  %v2419_v14 = vadd.f32 %v2418_v12, %v2417_v9  ;;  %v2381_v19 = vadd.f32 %v2380_v54, %v2379_v35  ;;  %v2386_v29 = vadd.f32 %v2385_v40, %v2384_v37  ;;  %4569 = vrcp.f32 %v2374_v11 }
 0x28a   : > { %v5629_v24 = vpop.eup %4561  ;;  %v2391_v26 = vadd.f32 %v2390_v53, %v2389_v62  ;;  %v2431_v4 = vsel %vm2200_vm6, %v5625_v8, 0.0  ;;  %v2255_v5 = vrot.slane %v2254_v34, 1  ;;  %v2303_v10 = vmax.f32 %v2301_v16, %v2302_v3 }
 0x28b   : > { %v2420_v1 = vrot.slane %v2419_v14, 2  ;;  %v2396_v39 = vsel %vm2200_vm6, %v5629_v24, 0.0  ;;  %v2432_v22 = vrot.slane %v2431_v4, 4  ;;  %v5635_v38 = vpop.eup %4563  ;;  %v2387_v15 = vrot.slane %v2386_v29, 1 }
 0x28c   : > { %v2392_v7 = vrot.slane %v2391_v26, 2  ;;  %v2397_v6 = vrot.slane %v2396_v39, 4  ;;  %v2256_v20 = vmax.f32 %v2254_v34, %v2255_v5  ;;  %v2265_v35 = vrot.slane %v2264_v46, 4 }
 0x28d   : > { %v2421_v50 = vadd.f32 %v2420_v1, %v2419_v14  ;;  %v2433_v63 = vadd.f32 %v2432_v22, %v2431_v4  ;;  %v2388_v58 = vadd.f32 %v2387_v15, %v2386_v29  ;;  %4571 = vrcp.f32 %v2381_v19 }
 0x28e   : > { %v2393_v41 = vadd.f32 %v2392_v7, %v2391_v26  ;;  %v2398_v60 = vadd.f32 %v2397_v6, %v2396_v39  ;;  %v5637_v37 = vpop.eup %4565  ;;  %v2320_v56 = vsub.f32 %v5593_v31, %v2256_v20  ;;  %v2304_v62 = vrot.slane %v2303_v10, 1 }
 0x28f   : > { %v2434_v9 = vrot.slane %v2433_v63, 2  ;;  %4573 = vtanh.f32 %v5511_v43  ;;  %v2403_v30 = vsel %vm2200_vm6, %v5637_v37, 0.0  ;;  %v2422_v16 = vrot.slane %v2421_v50, 1 }
 0x290   : > { %v2394_v11 = vrot.slane %v2393_v41, 1  ;;  %v2399_v12 = vrot.slane %v2398_v60, 2  ;;  %4575 = vrcp.f32 %v2388_v58  ;;  %v2404_v54 = vrot.slane %v2403_v30, 4 }
 0x291   : > { %v2343_v40 = vmul.f32 1.442695, %v2320_v56  ;;  %v2305_v3 = vmax.f32 %v2303_v10, %v2304_v62  ;;  %v2266_v19 = vmax.f32 %v2264_v46, %v2265_v35  ;;  %4577 = vtanh.f32 %v5515_v59 }
 0x292   : > { %v5643_v53 = vpop.eup %4567  ;;  %v2395_v14 = vadd.f32 %v2394_v11, %v2393_v41  ;;  %v2400_v34 = vadd.f32 %v2399_v12, %v2398_v60  ;;  %v2435_v31 = vadd.f32 %v2434_v9, %v2433_v63  ;;  %v2405_v29 = vadd.f32 %v2404_v54, %v2403_v30 }
 0x293   : > { %v2445_v43 = vsel %vm2200_vm6, %v5643_v53, 0.0  ;;  %v2327_v1 = vsub.f32 %v5597_v0, %v2305_v3  ;;  %v2423_v39 = vadd.f32 %v2422_v16, %v2421_v50  ;;  %v2267_v5 = vrot.slane %v2266_v19, 2  ;;  %v4570_v15 = vpop.eup %4569 }
 0x294   : > { %4579 = vrcp.f32 %v2395_v14  ;;  %v2401_v26 = vrot.slane %v2400_v34, 1  ;;  %v2446_v4 = vrot.slane %v2445_v43, 4  ;;  %v2406_v22 = vrot.slane %v2405_v29, 2 }
 0x295   : > { %4581 = vpow2.f32 %v2343_v40  ;;  %v2357_v46 = vmul.f32 1.442695, %v2327_v1  ;;  %v5650_v59 = vmul.f32 0.25, %v5591_v27  ;;  %v2436_v63 = vrot.slane %v2435_v31, 1 }
 0x296   : > { %v2402_v7 = vadd.f32 %v2401_v26, %v2400_v34  ;;  %v2447_v6 = vadd.f32 %v2446_v4, %v2445_v43  ;;  %v2407_v20 = vadd.f32 %v2406_v22, %v2405_v29  ;;  %v2268_v10 = vmax.f32 %v2266_v19, %v2267_v5 }
 0x297   : > { %v5653_v58 = vmul.f32 0.25, %v5601_v45  ;;  %v2278_v0 = vsel %vm2200_vm6, %v5650_v59, -inf  ;;  %v5658_v50 = vmul.f32 0.25, %v5613_v13  ;;  %v4572_v60 = vpop.eup %4571  ;;  %v2489_v12 = vmul.f32 %v5635_v38, %v5574_v21 }
 0x298   : > { %4583 = vrcp.f32 %v2402_v7  ;;  %v2448_v41 = vrot.slane %v2447_v6, 2  ;;  %v2408_v35 = vrot.slane %v2407_v20, 1  ;;  %v2269_v9 = vrot.slane %v2268_v10, 1 }
 0x299   : > { %4585 = vpow2.f32 %v2357_v46  ;;  %v2279_v27 = vrot.slane %v2278_v0, 4  ;;  %v4574_v56 = vpop.eup %4573  ;;  %v2292_v11 = vsel %vm2200_vm6, %v5653_v58, -inf  ;;  %v2306_v45 = vsel %vm2200_vm6, %v5658_v50, -inf  ;;  %4265 = vmatmul.mubr.msk.f32.vlgmr.msra.gmra.mrb[40].mxu0 %vm2200_vm6, %v2489_v12 }
 0x29a   : > { %v2449_v62 = vadd.f32 %v2448_v41, %v2447_v6  ;;  %v4576_v30 = vpop.eup %4575  ;;  %v2409_v16 = vadd.f32 %v2408_v35, %v2407_v20  ;;  %v2270_v13 = vmax.f32 %v2268_v10, %v2269_v9  ;;  %v2293_v40 = vrot.slane %v2292_v11, 4  ;;  %4273 = vmatpush3.msra.mxu0 %v5577_v18  ;;  %4274 = vmatprep.mubr.msk.f32.mxu0 %vm4830_vm1, %v4829_v52 }
 0x29b   : > { %v2280_v54 = vmax.f32 %v2278_v0, %v2279_v27  ;;  %4587 = vtanh.f32 %v5513_v44  ;;  %v2307_v14 = vrot.slane %v2306_v45, 4  ;;  %v2490_v34 = vmul.f32 %v4570_v15, %v5585_v17  ;;  %v4578_v19 = vpop.eup %4577  ;;  %4282 = vmatprep.subr.mxu0 %v4829_v52 }
 0x29c   : > { %v2491_v3 = vmul.f32 %v4572_v60, %v5595_v36  ;;  %4589 = vrcp.f32 %v2409_v16  ;;  %v2322_v29 = vsub.f32 %v5617_v42, %v2270_v13  ;;  %v2294_v21 = vmax.f32 %v2292_v11, %v2293_v40 }
 0x29d   : > { %v2281_v43 = vrot.slane %v2280_v54, 2  ;;  %v2437_v44 = vadd.f32 %v2436_v63, %v2435_v31  ;;  %v2450_v26 = vrot.slane %v2449_v62, 1  ;;  %v2308_v4 = vmax.f32 %v2306_v45, %v2307_v14  ;;  %4270 = vmatmul.mubr.msk.f32.vlgmr.msra.gmra.mrb[40].mxu1 %vm2200_vm6, %v2490_v34 }
 0x29e   : > { %v4580_v38 = vpop.eup %4579  ;;  %v2492_v17 = vmul.f32 %v4576_v30, %v5608_v33  ;;  %4591 = vrcp.f32 %v2423_v39  ;;  %v2347_v42 = vmul.f32 1.442695, %v2322_v29  ;;  %v2295_v22 = vrot.slane %v2294_v21, 2  ;;  %4278 = vmatpush3.msra.mxu1 %v5568_v28  ;;  %4279 = vmatprep.mubr.msk.f32.mxu1 %vm4830_vm1, %v4829_v52 }
 0x29f   : > { %v5677_v36 = vpop.eup %4581  ;;  %v2282_v1 = vmax.f32 %v2280_v54, %v2281_v43  ;;  %4593 = vtanh.f32 %v5520_v49  ;;  %v2309_v31 = vrot.slane %v2308_v4, 2  ;;  %4275 = vmatmul.mubr.msk.f32.vlgmr.msra.gmra.mrb[42].mxu0 %vm2200_vm6, %v2491_v3  ;;  %4287 = vmatprep.subr.mxu1 %v4829_v52  ;;  %v2493_v33 = vmul.f32 %v4580_v38, %v5619_v61 }
 0x2a0   : > { %v2410_v18 = vsel %vm2200_vm6, %v5677_v36, 0.0  ;;  %4595 = vpow2.f32 %v2347_v42  ;;  %v2296_v15 = vmax.f32 %v2294_v21, %v2295_v22  ;;  %4283 = vmatpush3.msra.mxu0 %v4574_v56  ;;  %4284 = vmatprep.mubr.msk.f32.mxu0 %vm4830_vm1, %v4829_v52  ;;  %v2451_v49 = vadd.f32 %v2450_v26, %v2449_v62 }
 0x2a1   : > { %v2411_v39 = vrot.slane %v2410_v18, 4  ;;  %v2283_v5 = vrot.slane %v2282_v1, 1  ;;  %4597 = vrcp.f32 %v2437_v44  ;;  %v2310_v7 = vmax.f32 %v2308_v4, %v2309_v31  ;;  %4280 = vmatmul.mubr.msk.f32.vlgmr.msra.gmra.mrb[42].mxu1 %vm2200_vm6, %v2492_v17  ;;  %4292 = vmatprep.subr.mxu0 %v4829_v52 }
 0x2a2   : > { %v4584_v28 = vpop.eup %4583  ;;  %v2297_v63 = vrot.slane %v2296_v15, 1  ;;  %4288 = vmatpush3.msra.mxu1 %v5581_v2  ;;  %4289 = vmatprep.mubr.msk.f32.mxu1 %vm4830_vm1, %v4829_v52  ;;  %4599 = vtanh.f32 %v5524_v23 }
 0x2a3   : > { %v5692_v6 = vpop.eup %4585  ;;  %v2412_v46 = vadd.f32 %v2411_v39, %v2410_v18  ;;  %v2284_v61 = vmax.f32 %v2282_v1, %v2283_v5  ;;  %v2494_v20 = vmul.f32 %v4584_v28, %v5629_v24  ;;  %v2311_v41 = vrot.slane %v2310_v7, 1  ;;  %4285 = vmatmul.mubr.msk.f32.vlgmr.msra.gmra.mrb[44].mxu0 %vm2200_vm6, %v2493_v33  ;;  %4297 = vmatprep.subr.mxu1 %v4829_v52 }
 0x2a4   : > { %v2459_v10 = vsel %vm2200_vm6, %v5692_v6, 0.0  ;;  %v2298_v2 = vmax.f32 %v2296_v15, %v2297_v63  ;;  %4293 = vmatpush3.msra.mxu0 %v4578_v19  ;;  %4294 = vmatprep.mubr.msk.f32.mxu0 %vm4830_vm1, %v4829_v52  ;;  %4601 = vrcp.f32 %v2451_v49 }
 0x2a5   : > { %v2413_v0 = vrot.slane %v2412_v46, 2  ;;  %v2460_v60 = vrot.slane %v2459_v10, 4  ;;  %v2324_v35 = vsub.f32 %v5650_v59, %v2284_v61  ;;  %v4588_v24 = vpop.eup %4587  ;;  %v2312_v23 = vmax.f32 %v2310_v7, %v2311_v41  ;;  %4290 = vmatmul.mubr.msk.f32.vlgmr.msra.gmra.mrb[44].mxu1 %vm2200_vm6, %v2494_v20  ;;  %4302 = vmatprep.subr.mxu0 %v4829_v52 }
 0x2a6   : > { %v4590_v9 = vpop.eup %4589  ;;  %v2326_v11 = vsub.f32 %v5653_v58, %v2298_v2  ;;  %4298 = vmatpush3.msra.mxu1 %v4588_v24  ;;  %4299 = vmatprep.mubr.msk.f32.mxu1 %vm4830_vm1, %v4829_v52  ;;  %4603 = vtanh.f32 %v5528_v51 }
 0x2a7   : > { %v2414_v27 = vadd.f32 %v2413_v0, %v2412_v46  ;;  %v2461_v56 = vadd.f32 %v2460_v60, %v2459_v10  ;;  %v2351_v62 = vmul.f32 1.442695, %v2324_v35  ;;  %v2328_v59 = vsub.f32 %v5658_v50, %v2312_v23  ;;  %4307 = vmatprep.subr.mxu1 %v4829_v52 }
 0x2a8   : > { %v2495_v45 = vmul.f32 %v4590_v9, %v5637_v37  ;;  %v4592_v12 = vpop.eup %4591  ;;  %v2355_v13 = vmul.f32 1.442695, %v2326_v11 }
 0x2a9   : > { %v2415_v30 = vrot.slane %v2414_v27, 1  ;;  %v2462_v16 = vrot.slane %v2461_v56, 2  ;;  %4605 = vpow2.f32 %v2351_v62  ;;  %v4594_v54 = vpop.eup %4593  ;;  %v2359_v58 = vmul.f32 1.442695, %v2328_v59 }
 0x2aa   : > { %4607 = vtanh.f32 %v5532_v47  ;;  %4295 = vmatmul.mubr.msk.f32.vlgmr.msra.gmra.mrb[46].mxu0 %vm2200_vm6, %v2495_v45  ;;  %v5717_v40 = vpop.eup %4595  ;;  %v2497_v47 = vmul.f32 %v4592_v12, %v5615_v32 }
 0x2ab   : > { %v2416_v51 = vadd.f32 %v2415_v30, %v2414_v27  ;;  %v2463_v14 = vadd.f32 %v2462_v16, %v2461_v56  ;;  %4609 = vpow2.f32 %v2355_v13  ;;  %4303 = vmatpush3.msra.mxu0 %v4594_v54  ;;  %4304 = vmatprep.mubr.msk.f32.mxu0 %vm4830_vm1, %v4829_v52  ;;  %v4598_v37 = vpop.eup %4597  ;;  %v2424_v50 = vsel %vm2200_vm6, %v5717_v40, 0.0 }
 0x2ac   : > { %4611 = vpow2.f32 %v2359_v58  ;;  %4312 = vmatprep.subr.mxu0 %v4829_v52  ;;  %v2425_v3 = vrot.slane %v2424_v50, 4  ;;  %v4600_v19 = vpop.eup %4599  ;;  %v2499_v38 = vmul.f32 %v4598_v37, %v5625_v8 }
 0x2ad   : > { %4613 = vrcp.f32 %v2416_v51  ;;  %v2464_v34 = vrot.slane %v2463_v14, 1 }
 0x2ae   : > { %4305 = vmatmul.mubr.msk.f32.vlgmr.msra.gmra.mrb[48].mxu0 %vm2200_vm6, %v2497_v47  ;;  %v2426_v43 = vadd.f32 %v2425_v3, %v2424_v50  ;;  %v4602_v21 = vpop.eup %4601  ;;  %4615 = vtanh.f32 %v5518_v48 }
 0x2af   : > { %v2465_v29 = vadd.f32 %v2464_v34, %v2463_v14  ;;  %4313 = vmatpush3.msra.mxu0 %v4600_v19  ;;  %4314 = vmatprep.mubr.msk.f32.mxu0 %vm4830_vm1, %v4829_v52  ;;  %v2501_v48 = vmul.f32 %v4602_v21, %v5643_v53 }
 0x2b0   : > { %4322 = vmatprep.subr.mxu0 %v4829_v52  ;;  %v2427_v32 = vrot.slane %v2426_v43, 2  ;;  %v4604_v44 = vpop.eup %4603 }
 0x2b1   : > { %4617 = vrcp.f32 %v2465_v29 }
 0x2b2   : > { %4315 = vmatmul.mubr.msk.f32.vlgmr.msra.gmra.mrb[50].mxu0 %vm2200_vm6, %v2499_v38  ;;  %v2428_v4 = vadd.f32 %v2427_v32, %v2426_v43 }
 0x2b3   : > { %v4606_v26 = vpop.eup %4605  ;;  %4323 = vmatpush3.msra.mxu0 %v4604_v44  ;;  %4324 = vmatprep.mubr.msk.f32.mxu0 %vm4830_vm1, %v4829_v52 }
 0x2b4   : > { %v4608_v17 = vpop.eup %4607  ;;  %v2438_v42 = vsel %vm2200_vm6, %v4606_v26, 0.0  ;;  %4332 = vmatprep.subr.mxu0 %v4829_v52  ;;  %v2429_v8 = vrot.slane %v2428_v4, 1 }
 0x2b5   : > { %v4610_v1 = vpop.eup %4609  ;;  %v2439_v22 = vrot.slane %v2438_v42, 4 }
 0x2b6   : > { %v4612_v18 = vpop.eup %4611  ;;  %v2452_v31 = vsel %vm2200_vm6, %v4610_v1, 0.0  ;;  %4325 = vmatmul.mubr.msk.f32.vlgmr.msra.gmra.mrb[52].mxu0 %vm2200_vm6, %v2501_v48  ;;  %v2430_v39 = vadd.f32 %v2429_v8, %v2428_v4 }
 0x2b7   : > { %v4614_v33 = vpop.eup %4613  ;;  %v2440_v5 = vadd.f32 %v2439_v22, %v2438_v42  ;;  %v2453_v15 = vrot.slane %v2452_v31, 4  ;;  %v2466_v28 = vsel %vm2200_vm6, %v4612_v18, 0.0  ;;  %4333 = vmatpush3.msra.mxu0 %v4608_v17  ;;  %4334 = vmatprep.mubr.msk.f32.mxu0 %vm4830_vm1, %v4829_v52 }
 0x2b8   : > { %v2467_v49 = vrot.slane %v2466_v28, 4  ;;  %v2496_v53 = vmul.f32 %v4614_v33, %v5677_v36  ;;  %4619 = vrcp.f32 %v2430_v39  ;;  %v4616_v61 = vpop.eup %4615 }
 0x2b9   : > { %v2441_v7 = vrot.slane %v2440_v5, 2  ;;  %v2454_v46 = vadd.f32 %v2453_v15, %v2452_v31  ;;  %4621 = vtanh.f32 %v5522_v55 }
 0x2ba   : > { %v2468_v63 = vadd.f32 %v2467_v49, %v2466_v28  ;;  %4300 = vmatmul.mubr.msk.f32.vlgmr.msra.gmra.mrb[46].mxu1 %vm2200_vm6, %v2496_v53 }
 0x2bb   : > { %v4618_v20 = vpop.eup %4617  ;;  %v2442_v10 = vadd.f32 %v2441_v7, %v2440_v5  ;;  %v2455_v41 = vrot.slane %v2454_v46, 2  ;;  %4308 = vmatpush3.msra.mxu1 %v4616_v61  ;;  %4309 = vmatprep.mubr.msk.f32.mxu1 %vm4830_vm1, %v4829_v52 }
 0x2bc   : > { %v2469_v0 = vrot.slane %v2468_v63, 2  ;;  %4317 = vmatprep.subr.mxu1 %v4829_v52  ;;  %v2503_v36 = vmul.f32 %v4618_v20, %v5692_v6 }
 0x2bd   : > { %v2443_v60 = vrot.slane %v2442_v10, 1  ;;  %v2456_v35 = vadd.f32 %v2455_v41, %v2454_v46 }
 0x2be   : > { %v2470_v2 = vadd.f32 %v2469_v0, %v2468_v63  ;;  %4335 = vmatmul.mubr.msk.f32.vlgmr.msra.gmra.mrb[54].mxu0 %vm2200_vm6, %v2503_v36 }
 0x2bf   : > { %v2444_v24 = vadd.f32 %v2443_v60, %v2442_v10  ;;  %v2457_v23 = vrot.slane %v2456_v35, 1 }
 0x2c0   : > { %v2471_v9 = vrot.slane %v2470_v2, 1 }
 0x2c1   : > { %4623 = vrcp.f32 %v2444_v24  ;;  %v2458_v27 = vadd.f32 %v2457_v23, %v2456_v35 }
 0x2c2   : > { %v2472_v56 = vadd.f32 %v2471_v9, %v2470_v2  ;;  %v4620_v62 = vpop.eup %4619 }
 0x2c3   : > { %4625 = vrcp.f32 %v2458_v27  ;;  %v2498_v55 = vmul.f32 %v4620_v62, %v5717_v40  ;;  %v4622_v11 = vpop.eup %4621 }
 0x2c4   : > { %4627 = vtanh.f32 %v5526_v25 }
 0x2c5   : > { %4629 = vrcp.f32 %v2472_v56  ;;  %4310 = vmatmul.mubr.msk.f32.vlgmr.msra.gmra.mrb[48].mxu1 %vm2200_vm6, %v2498_v55 }
 0x2c6   : > { %4318 = vmatpush3.msra.mxu1 %v4622_v11  ;;  %4319 = vmatprep.mubr.msk.f32.mxu1 %vm4830_vm1, %v4829_v52  ;;  %4631 = vtanh.f32 %v5530_v57 }
 0x2c7   : > { %4327 = vmatprep.subr.mxu1 %v4829_v52 }
 0x2cb   : > { %v4624_v6 = vpop.eup %4623 }
 0x2cc   : > { %v2500_v59 = vmul.f32 %v4624_v6, %v4606_v26 }
 0x2cd   : > { %v4626_v45 = vpop.eup %4625 }
 0x2ce   : > { %v4628_v12 = vpop.eup %4627  ;;  %4320 = vmatmul.mubr.msk.f32.vlgmr.msra.gmra.mrb[50].mxu1 %vm2200_vm6, %v2500_v59  ;;  %v2502_v25 = vmul.f32 %v4626_v45, %v4610_v1 }
 0x2cf   : > { %v4630_v30 = vpop.eup %4629  ;;  %4328 = vmatpush3.msra.mxu1 %v4628_v12  ;;  %4329 = vmatprep.mubr.msk.f32.mxu1 %vm4830_vm1, %v4829_v52 }
 0x2d0   : > { %4337 = vmatprep.subr.mxu1 %v4829_v52  ;;  %v4632_v16 = vpop.eup %4631  ;;  %v2504_v57 = vmul.f32 %v4630_v30, %v4612_v18 }
 0x2d2   : > { %4330 = vmatmul.mubr.msk.f32.vlgmr.msra.gmra.mrb[52].mxu1 %vm2200_vm6, %v2502_v25 }
 0x2d3   : > { %4338 = vmatpush3.msra.mxu1 %v4632_v16  ;;  %4339 = vmatprep.mubr.msk.f32.mxu1 %vm4830_vm1, %v4829_v52 }
 0x2d6   : > { %4340 = vmatmul.mubr.msk.f32.vlgmr.msra.gmra.mrb[54].mxu1 %vm2200_vm6, %v2504_v57 }
 0x36c   : > { %v2574_v13 = vpop.f32.mrb[40].mxu0 }
 0x36d   : > { %3673 = vst.msk [vmem:[%s5767_s12] sm:$0xff] %vm374_vm0, %v2574_v13  ;;  %v4266_v54 = vpop.f32.mrb[41].mxu0 }
 0x370   : > { %v2647_v58 = vpop.f32.mrb[40].mxu1 }
 0x371   : > { %3674 = vst.msk [vmem:[%s5767_s12 + $0x8] sm:$0xff] %vm374_vm0, %v2647_v58  ;;  %v4271_v52 = vpop.f32.mrb[41].mxu1 }
 0x372   : > { %v2720_v40 = vpop.f32.mrb[42].mxu0 }
 0x373   : > { %3675 = vst.msk [vmem:[%s5767_s12 + $0x10] sm:$0xff] %vm374_vm0, %v2720_v40  ;;  %v4276_v51 = vpop.f32.mrb[43].mxu0 }
 0x374   : > { %v2793_v14 = vpop.f32.mrb[42].mxu1 }
 0x375   : > { %3676 = vst.msk [vmem:[%s5767_s12 + $0x18] sm:$0xff] %vm374_vm0, %v2793_v14  ;;  %v4281_v37 = vpop.f32.mrb[43].mxu1 }
 0x376   : > { %v2866_v50 = vpop.f32.mrb[44].mxu0 }
 0x377   : > { %3677 = vst.msk [vmem:[%s5767_s12 + $0x20] sm:$0xff] %vm374_vm0, %v2866_v50  ;;  %v4286_v47 = vpop.f32.mrb[45].mxu0 }
 0x378   : > { %v2939_v34 = vpop.f32.mrb[44].mxu1 }
 0x379   : > { %3678 = vst.msk [vmem:[%s5767_s12 + $0x28] sm:$0xff] %vm374_vm0, %v2939_v34  ;;  %v4291_v3 = vpop.f32.mrb[45].mxu1 }
 0x37d   : > { %v3012_v19 = vpop.f32.mrb[46].mxu0 }
 0x37e   : > { %3679 = vst.msk [vmem:[%s5767_s12 + $0x30] sm:$0xff] %vm374_vm0, %v3012_v19  ;;  %v4296_v29 = vpop.f32.mrb[47].mxu0 }
 0x381   : > { %v3158_v43 = vpop.f32.mrb[48].mxu0 }
 0x382   : > { %3681 = vst.msk [vmem:[%s5767_s12 + $0x40] sm:$0xff] %vm374_vm0, %v3158_v43  ;;  %v4306_v21 = vpop.f32.mrb[49].mxu0 }
 0x385   : > { %v3304_v38 = vpop.f32.mrb[50].mxu0 }
 0x386   : > { %3683 = vst.msk [vmem:[%s5767_s12 + $0x50] sm:$0xff] %vm374_vm0, %v3304_v38  ;;  %v4316_v32 = vpop.f32.mrb[51].mxu0 }
 0x389   : > { %v3450_v44 = vpop.f32.mrb[52].mxu0 }
 0x38a   : > { %3685 = vst.msk [vmem:[%s5767_s12 + $0x60] sm:$0xff] %vm374_vm0, %v3450_v44  ;;  %v4326_v26 = vpop.f32.mrb[53].mxu0 }
 0x38d   : > { %v3085_v4 = vpop.f32.mrb[46].mxu1 }
 0x38e   : > { %3680 = vst.msk [vmem:[%s5767_s12 + $0x38] sm:$0xff] %vm374_vm0, %v3085_v4  ;;  %v4301_v17 = vpop.f32.mrb[47].mxu1 }
 0x391   : > { %v3596_v42 = vpop.f32.mrb[54].mxu0 }
 0x392   : > { %3687 = vst.msk [vmem:[%s5767_s12 + $0x70] sm:$0xff] %vm374_vm0, %v3596_v42  ;;  %v4336_v48 = vpop.f32.mrb[55].mxu0 }
 0x398   : > { %v3231_v1 = vpop.f32.mrb[48].mxu1 }
 0x399   : > { %3682 = vst.msk [vmem:[%s5767_s12 + $0x48] sm:$0xff] %vm374_vm0, %v3231_v1  ;;  %v4311_v8 = vpop.f32.mrb[49].mxu1 }
 0x3a1   : > { %v3377_v22 = vpop.f32.mrb[50].mxu1 }
 0x3a2   : > { %3684 = vst.msk [vmem:[%s5767_s12 + $0x58] sm:$0xff] %vm374_vm0, %v3377_v22  ;;  %v4321_v18 = vpop.f32.mrb[51].mxu1 }
 0x3a5   : > { %v3523_v31 = vpop.f32.mrb[52].mxu1 }
 0x3a6   : > { %3686 = vst.msk [vmem:[%s5767_s12 + $0x68] sm:$0xff] %vm374_vm0, %v3523_v31  ;;  %v4331_v33 = vpop.f32.mrb[53].mxu1 }
 0x3a9   : > { %v3669_v39 = vpop.f32.mrb[54].mxu1 }
 0x3aa   : > { %3688 = vst.msk [vmem:[%s5767_s12 + $0x78] sm:$0xff] %vm374_vm0, %v3669_v39  ;;  %v4341_v5 = vpop.f32.mrb[55].mxu1 }
 0x3ab   : > { %4760 = shalt.err (!%p4757_p4)
}
 0x3ac   : > { %s4761_s13 = scalar_lea.hbm %s5804_s23, 2048  ;;  %s4765_s14 = scalar_lea.hbm %s5859_s7, 4096 }
 0x3ad   : > { %p4762_p9 = scmp.ne.s32.totalorder %s5804_s23, %s4761_s13  ;;  %p4766_p8 = scmp.lt.u32.totalorder %s5804_s23, %s5859_s7 }
 0x3ae   : > { %p4767_p13 = scmp.lt.u32.totalorder %s4765_s14, %s4761_s13  ;;  %p4769_p10 = scmp.lt.u32.totalorder %s4761_s13, %s5804_s23 }
 0x3af   : > { %p4763_p0 = pnand %p4762_p9, %p5028_p5 }
 0x3b0   : > { %p4768_p6 = por %p4767_p13, %p4766_p8 }
 0x3b1   : > { %p4764_p11 = pneg %p4763_p0 }
 0x3b2   : > { %p4770_p3 = por %p4769_p10, %p4768_p6 }
 0x3b4   : > { %p4771_p7 = pnand %p4770_p3, %p4764_p11 }
 0x3b6   : > { %4774 = shalt.err (!%p4771_p7)
}
 0x3b7   : > { %s4832_s16 = smov 128   ;;  %s4833_s29 = smov 8  }
 0x3b8   : > { %4404 = dma.vmem_to_hbm [thread:$0]  (%p5028_p5), %s5806_s21, 2048, %s5804_s23, %s3690_s28, %s4832_s16, %s4832_s16, %s4833_s29  }
 0x3b9 PF: > { %s5879_s11 = sld [smem:[#allocation15_spill]]  ;;  %s3718_s8 = sand.u32 1, %s4809_s24  }
 0x3ba   : > { %p5881_p1 = scmp.ge.s32.totalorder %s4821_s27, 2  ;;  %s3719_s30 = scalar_lea.sflag [#allocation4], %s3718_s8 }
 0x3bf   : > { %p5880_p12 = scmp.ne.s32.totalorder %s5879_s11, 0 }
 0x3c1   : > { %p4421_p2 = pnand %p5881_p1, %p5880_p12 }
 0x3c3   : > { %4804 = dma.done.wait (!%p4421_p2), %s3719_s30, 2048  }
 0x3c4   : > { %4806 = vsyncadd (!%p4421_p2), %s3719_s30, 4294965248  ;;  %p22_p4 = scmp.ge.s32.totalorder %s5014_s22, 4   ;;  %s5882_s24 = smov %s4813_s25 }
 0x3c5   : > { %s5883_s25 = smov %s4817_s26  ;;  %s5884_s26 = smov %s5024_s18 }
 0x3c6   : > { %s5885_s27 = smov %s5014_s22  ;;  %24 = sbr.rel (!%p22_p4) target bundleno = 7 (0x7), region = 105 }
 0x3cd   :  { %3724 = vsyncpa [#allocation3], 1 }
 0x3ce   :  { %3726 = vsyncpa [#allocation3 + $0x1], 1 }
 0x3cf   :  { %3727 = vsyncpa [#allocation6], 1 }
 0x3d0   :  { %3728 = vsyncpa [#allocation9], 1 }
 0x3d1   :  { %3729 = vsyncpa [#allocation4], 1 }
 0x3d2   :  { %3731 = vsyncpa [#allocation4 + $0x1], 1 }

</bundles_post_ra>
